<compile_context>
chip_gen: v5e
topology: v5e:2x2
jax: 0.10.0
libtpu: 0.0.40
codegen_flags: <defaults>
</compile_context>

<pallas_src>
import numpy as np
import jax
import jax.numpy as jnp
from jax import lax
from jax.experimental import pallas as pl
from jax.experimental.pallas import tpu as pltpu

# ---------------- small-model config (consistent with the module's forward) ----------------
B = 2            # batch
T = 4            # sequence length
H_IMG = 8        # input_height
W_IMG = 16       # input_width
C_CONV = 8       # conv_out_channels per branch
F_CNN = 32       # fc_out_features == cnn_feature_dim (LSTM input size)
H_LSTM = 32      # lstm_hidden_size
OUT_DIM = 2      # output_dim
HP, WP = H_IMG // 2, W_IMG // 2    # pooled height/width (4, 8)
SP = HP * WP                       # pooled spatial size (32)
CC = 3 * C_CONV                    # concatenated conv channels (24)
CPAD = 32                          # channels padded to 32
S_LO = 4                           # pooled-pixel positions packed into lanes
S_HI = SP // S_LO                  # remaining pooled-pixel groups in rows (8)
KTOT = 1 + 9 + 25                  # concatenated im2col tap width (35)
KPAD = 40                          # taps padded to a multiple of 8
KBLK = S_LO * KPAD                 # block-diagonal K (160)
NBLK = S_LO * CPAD                 # lane-dense conv output width (128)
FLATP = SP * CPAD                  # padded, lane-dense flat width (1024)
OUTPAD = 128                       # lane-padded final output width
EPS = 1e-5


# ============================ fused Pallas kernel ============================

def fused_kernel(p_ref, wc_ref, bc_ref, wfc_ref, bfc_ref,
                 wih0_ref, whh0_ref, b0_ref, w1_ref, b1_ref,
                 lng_ref, lnb_ref, wf1_ref, bf1_ref, wf2_ref, bf2_ref,
                 o_ref, hbuf_ref):
    """One grid step == NB batch elements: CNN + FC + 2-layer LSTM + LN + fc1 + fc2."""
    rows = p_ref.shape[1]           # 4 * S_HI * NB * T
    blk = rows // 4                 # S_HI * NB * T  (one pooling-quadrant block)
    nbt = blk // S_HI               # NB * T
    nb = nbt // T                   # batch elements handled in this grid step

    # ---- conv(1x1|3x3|5x5) + folded eval-BN + ReLU: ONE lane-dense matmul ----
    y = jnp.dot(p_ref[0], wc_ref[...], preferred_element_type=jnp.float32) + bc_ref[...]
    y = jnp.maximum(y, 0.0)                                   # (4*S_HI*nbt, 128) full vregs

    # ---- 2x2 maxpool: max over the 4 quadrant row-blocks (no cross-lane ops) ----
    pooled = jnp.maximum(jnp.maximum(y[0:blk], y[blk:2 * blk]),
                         jnp.maximum(y[2 * blk:3 * blk], y[3 * blk:4 * blk]))   # (S_HI*nbt, 128)

    # ---- flatten: lane-concat the S_HI row-blocks -> lane-dense (nbt, 1024), rows = (t, b) ----
    flat = jnp.concatenate([pooled[i * nbt:(i + 1) * nbt] for i in range(S_HI)], axis=1)

    # ---- CNN head FC: one (nbt, 1024) @ (1024, 32) matmul ----
    feat = (jnp.dot(flat, wfc_ref[...], preferred_element_type=jnp.float32)
            + bfc_ref[...])                                   # (nbt, F_CNN)

    # ---- LSTM layer-0 input projection hoisted out of the recurrence (one batched matmul) ----
    xg0 = (jnp.dot(feat, wih0_ref[...], preferred_element_type=jnp.float32)
           + b0_ref[...])                                     # (nbt, 4H)
    whh0 = whh0_ref[...]
    w1 = w1_ref[...]
    b1 = b1_ref[...]

    # single-tanh gates: sigmoid(x) = 0.5*tanh(x/2) + 0.5 on i/f/o lanes, tanh(x) on g lanes
    lane = lax.broadcasted_iota(jnp.int32, (1, 4 * H_LSTM), 1)
    is_g = (lane >= 2 * H_LSTM) & (lane < 3 * H_LSTM)
    scale = jnp.where(is_g, 1.0, 0.5)
    shift = jnp.where(is_g, 0.0, 0.5)

    def cell_update(gates, c):
        act = jnp.tanh(gates * scale) * scale + shift         # one EUP tanh pass over 4H lanes
        i_g = act[:, 0:H_LSTM]
        f_g = act[:, H_LSTM:2 * H_LSTM]
        g_g = act[:, 2 * H_LSTM:3 * H_LSTM]
        o_g = act[:, 3 * H_LSTM:4 * H_LSTM]
        c_new = f_g * c + i_g * g_g
        h_new = o_g * jnp.tanh(c_new)
        return h_new, c_new

    zeros = jnp.zeros((nb, H_LSTM), jnp.float32)
    h0, c0, h1, c1 = zeros, zeros, zeros, zeros
    for t in range(T):                                        # recurrence: 2 matmuls / step
        gates0 = xg0[t * nb:(t + 1) * nb, :] + jnp.dot(
            h0, whh0, preferred_element_type=jnp.float32)
        h0, c0 = cell_update(gates0, c0)
        xh = jnp.concatenate([h0, h1], axis=1)                # layer-1 [x, h] -> one fused matmul
        gates1 = jnp.dot(xh, w1, preferred_element_type=jnp.float32) + b1
        h1, c1 = cell_update(gates1, c1)
        hbuf_ref[t * nb:(t + 1) * nb, :] = h1

    # ---- LayerNorm + fc1(ReLU) + fc2 (lane-padded), batched over all nbt rows ----
    hcat = hbuf_ref[...]                                      # (nbt, H_LSTM)
    mu = jnp.mean(hcat, axis=-1, keepdims=True)
    var = jnp.mean((hcat - mu) ** 2, axis=-1, keepdims=True)
    yln = (hcat - mu) * lax.rsqrt(var + EPS) * lng_ref[...] + lnb_ref[...]
    y1 = jnp.maximum(jnp.dot(yln, wf1_ref[...], preferred_element_type=jnp.float32)
                     + bf1_ref[...], 0.0)
    # single unmasked full-width (nbt, 128) store; wrapper slices the 2 real columns
    o_ref[0] = jnp.dot(y1, wf2_ref[...], preferred_element_type=jnp.float32) + bf2_ref[...]


# ============================ pallas_call wrapper ============================

def run_fused(P, cw, cb, wfc, bfc, lp, nb):
    ng = B // nb
    rows = 4 * S_HI * nb * T
    nbt = nb * T
    wspec = lambda shape: pl.BlockSpec(shape, lambda g: (0, 0))
    return pl.pallas_call(
        fused_kernel,
        out_shape=jax.ShapeDtypeStruct((ng, nbt, OUTPAD), jnp.float32),
        grid_spec=pltpu.PrefetchScalarGridSpec(
            num_scalar_prefetch=0,
            grid=(ng,),
            in_specs=[
                pl.BlockSpec((1, rows, KBLK), lambda g: (g, 0, 0)),
                wspec((KBLK, NBLK)), wspec((1, NBLK)),
                wspec((FLATP, F_CNN)), wspec((1, F_CNN)),
                wspec((F_CNN, 4 * H_LSTM)), wspec((H_LSTM, 4 * H_LSTM)), wspec((1, 4 * H_LSTM)),
                wspec((2 * H_LSTM, 4 * H_LSTM)), wspec((1, 4 * H_LSTM)),
                wspec((1, H_LSTM)), wspec((1, H_LSTM)),
                wspec((H_LSTM, H_LSTM)), wspec((1, H_LSTM)),
                wspec((H_LSTM, OUTPAD)), wspec((1, OUTPAD)),
            ],
            out_specs=pl.BlockSpec((1, nbt, OUTPAD), lambda g: (g, 0, 0)),
            scratch_shapes=[pltpu.VMEM((nbt, H_LSTM), jnp.float32)],
        ),
        compiler_params=pltpu.CompilerParams(dimension_semantics=("parallel",)),
    )(P, cw, cb, wfc, bfc,
      lp['wih0'], lp['whh0'], lp['b0'], lp['w1'], lp['b1'],
      lp['ln_g'], lp['ln_b'], lp['wf1'], lp['bf1'], lp['wf2'], lp['bf2'])


# ============================ plain-JAX glue (layout plumbing only) ============================

def im2col(x, ksize, pad):
    """x: (N, H, W) -> (N, H, W, k*k); tap index = dy*k+dx (matches OIHW weight flatten)."""
    N, H, W = x.shape
    xp = jnp.pad(x, ((0, 0), (pad, pad), (pad, pad)))
    rows = []
    for dy in range(ksize):
        cols = [xp[:, dy:dy + H, dx:dx + W] for dx in range(ksize)]
        rows.append(jnp.stack(cols, axis=-1))
    return jnp.stack(rows, axis=-2).reshape(N, H, W, ksize * ksize)


def build_taps(x, nb):
    """x: (B, T, 1, H, W) -> P: (B//nb, 4*S_HI*nb*T, S_LO*KPAD).

    Row (per grid step) = q*(S_HI*nb*T) + s_hi*(nb*T) + t*nb + b_local, with q = 2x2 pool
    quadrant and pooled pixel s = s_hi*4 + s_lo (s_lo packed into the K/lane block-diagonal).
    """
    ng = B // nb
    xi = x.reshape(B * T, H_IMG, W_IMG)                        # n = b*T + t
    taps = jnp.concatenate([im2col(xi, 1, 0), im2col(xi, 3, 1), im2col(xi, 5, 2)], axis=-1)
    taps = jnp.pad(taps, ((0, 0), (0, 0), (0, 0), (0, KPAD - KTOT)))
    # (g, bl, t, ph, qy, pwh, s_lo, qx, k)
    taps = taps.reshape(ng, nb, T, HP, 2, 2, S_LO, 2, KPAD)
    # -> (g, qy, qx, ph, pwh, t, bl, s_lo, k)
    taps = jnp.transpose(taps, (0, 4, 7, 3, 5, 2, 1, 6, 8))
    return taps.reshape(ng, 4 * S_HI * nb * T, KBLK)


def fold_conv_params(p):
    """Fold eval-mode BN into the conv weights; build the block-diagonal (KBLK, NBLK) weight."""
    def fold(wname, bname, bn):
        scale = p[bn + '_g'] / jnp.sqrt(p[bn + '_v'] + EPS)
        wf = p[wname].reshape(C_CONV, -1).T * scale[None, :]
        bf = (p[bname] - p[bn + '_m']) * scale + p[bn + '_b']
        return wf, bf

    w1, b1 = fold('conv1_w', 'conv1_b', 'bn1')
    w3, b3 = fold('conv3_w', 'conv3_b', 'bn3')
    w5, b5 = fold('conv5_w', 'conv5_b', 'bn5')
    w_all = jnp.zeros((KPAD, CPAD), jnp.float32)
    w_all = w_all.at[0:1, 0:C_CONV].set(w1)
    w_all = w_all.at[1:10, C_CONV:2 * C_CONV].set(w3)
    w_all = w_all.at[10:35, 2 * C_CONV:3 * C_CONV].set(w5)
    b_all = jnp.concatenate([b1, b3, b5, jnp.zeros((CPAD - CC,), jnp.float32)]).reshape(1, CPAD)
    # block-diagonal over the S_LO lane-packed pooled-pixel positions
    w_block = jnp.kron(jnp.eye(S_LO, dtype=jnp.float32), w_all)   # (160, 128)
    b_block = jnp.tile(b_all, (1, S_LO))                          # (1, 128)
    return w_block, b_block


def batch_per_grid_step():
    """v7x (2 TensorCores): 1 batch element per 'parallel' grid step; single-TC chips: fold B."""
    try:
        kind = jax.devices()[0].device_kind.lower()
    except Exception:
        kind = ""
    return 1 if "v7" in kind else B


@jax.jit
def pallas_forward(x, p):
    """x: (B, T, 1, H_IMG, W_IMG) float32 -> (B, T, OUT_DIM)."""
    nb = batch_per_grid_step()
    ng = B // nb
    P = build_taps(x, nb)
    cw, cb = fold_conv_params(p)
    # FC weight permuted / zero-padded to the in-kernel flat layout flat[:, s*CPAD + c].
    wfc3 = jnp.transpose(p['fc_w'].reshape(F_CNN, CC, SP), (2, 1, 0))   # (SP, CC, F)
    wfc = jnp.pad(wfc3, ((0, 0), (0, CPAD - CC), (0, 0))).reshape(FLATP, F_CNN)
    bfc = p['fc_b'].reshape(1, F_CNN)

    lp = dict(
        wih0=p['wih_l0'].T,
        whh0=p['whh_l0'].T,
        b0=(p['bih_l0'] + p['bhh_l0']).reshape(1, -1),
        # layer 1: Wih/Whh stacked -> ONE matmul per step fed with concat([h0, h1])
        w1=jnp.concatenate([p['wih_l1'].T, p['whh_l1'].T], axis=0),
        b1=(p['bih_l1'] + p['bhh_l1']).reshape(1, -1),
        ln_g=p['ln_g'].reshape(1, -1), ln_b=p['ln_b'].reshape(1, -1),
        wf1=p['fc1_w'].T, bf1=p['fc1_b'].reshape(1, -1),
        # fc2 zero-padded to 128 lanes so the final store is unmasked and lane-dense
        wf2=jnp.pad(p['fc2_w'].T, ((0, 0), (0, OUTPAD - OUT_DIM))),
        bf2=jnp.pad(p['fc2_b'].reshape(1, -1), ((0, 0), (0, OUTPAD - OUT_DIM))),
    )
    out = run_fused(P, cw, cb, wfc, bfc, lp, nb)              # (ng, nb*T, OUTPAD), rows = (t, b)
    out = out[:, :, :OUT_DIM].reshape(ng, T, nb, OUT_DIM)
    return jnp.transpose(out, (0, 2, 1, 3)).reshape(B, T, OUT_DIM)


# ============================ deterministic params + reference ============================

def init_params(key):
    ks = jax.random.split(key, 40)
    idx = iter(range(40))

    def w(shape, fan_in):
        return jax.random.normal(ks[next(idx)], shape, jnp.float32) / np.sqrt(fan_in)

    p = {}
    p['conv1_w'] = w((C_CONV, 1, 1, 1), 1)
    p['conv1_b'] = w((C_CONV,), 1)
    p['conv3_w'] = w((C_CONV, 1, 3, 3), 9)
    p['conv3_b'] = w((C_CONV,), 9)
    p['conv5_w'] = w((C_CONV, 1, 5, 5), 25)
    p['conv5_b'] = w((C_CONV,), 25)
    for name in ['bn1', 'bn3', 'bn5']:
        p[name + '_g'] = 1.0 + 0.1 * jax.random.normal(ks[next(idx)], (C_CONV,), jnp.float32)
        p[name + '_b'] = 0.1 * jax.random.normal(ks[next(idx)], (C_CONV,), jnp.float32)
        p[name + '_m'] = 0.1 * jax.random.normal(ks[next(idx)], (C_CONV,), jnp.float32)
        p[name + '_v'] = 0.5 + 0.5 * jnp.abs(jax.random.normal(ks[next(idx)], (C_CONV,), jnp.float32))
    p['fc_w'] = w((F_CNN, CC * SP), CC * SP)
    p['fc_b'] = w((F_CNN,), CC * SP)
    p['wih_l0'] = w((4 * H_LSTM, F_CNN), F_CNN)
    p['whh_l0'] = w((4 * H_LSTM, H_LSTM), H_LSTM)
    p['bih_l0'] = w((4 * H_LSTM,), H_LSTM)
    p['bhh_l0'] = w((4 * H_LSTM,), H_LSTM)
    p['wih_l1'] = w((4 * H_LSTM, H_LSTM), H_LSTM)
    p['whh_l1'] = w((4 * H_LSTM, H_LSTM), H_LSTM)
    p['bih_l1'] = w((4 * H_LSTM,), H_LSTM)
    p['bhh_l1'] = w((4 * H_LSTM,), H_LSTM)
    p['ln_g'] = jnp.ones((H_LSTM,), jnp.float32)     # PyTorch LayerNorm default init
    p['ln_b'] = jnp.zeros((H_LSTM,), jnp.float32)
    p['fc1_w'] = w((H_LSTM, H_LSTM), H_LSTM)
    p['fc1_b'] = w((H_LSTM,), H_LSTM)
    p['fc2_w'] = w((OUT_DIM, H_LSTM), H_LSTM)
    p['fc2_b'] = w((OUT_DIM,), H_LSTM)
    return p


def ref_forward(x, p):
    """Pure-JAX replica of the PyTorch forward (eval-mode BN), for validation."""
    N = B * T
    xi = x.reshape(N, 1, H_IMG, W_IMG)

    def branch(wn, bn_, bn, pad):
        y = lax.conv_general_dilated(xi, p[wn], (1, 1), [(pad, pad), (pad, pad)],
                                     dimension_numbers=('NCHW', 'OIHW', 'NCHW'))
        y = y + p[bn_][None, :, None, None]
        g, be, m, v = p[bn + '_g'], p[bn + '_b'], p[bn + '_m'], p[bn + '_v']
        y = ((y - m[None, :, None, None]) / jnp.sqrt(v[None, :, None, None] + EPS)
             * g[None, :, None, None] + be[None, :, None, None])
        y = jnp.maximum(y, 0.0)
        return lax.reduce_window(y, -jnp.inf, lax.max, (1, 1, 2, 2), (1, 1, 2, 2), 'VALID')

    y1 = branch('conv1_w', 'conv1_b', 'bn1', 0)
    y3 = branch('conv3_w', 'conv3_b', 'bn3', 1)
    y5 = branch('conv5_w', 'conv5_b', 'bn5', 2)
    feat = jnp.concatenate([y1, y3, y5], axis=1).reshape(N, -1)
    feat = feat @ p['fc_w'].T + p['fc_b']
    feat = feat.reshape(B, T, F_CNN)

    def lstm_layer(seq, wih, whh, bih, bhh):
        h = jnp.zeros((B, H_LSTM), jnp.float32)
        c = jnp.zeros((B, H_LSTM), jnp.float32)
        outs = []
        for t in range(T):
            gates = seq[:, t] @ wih.T + bih + h @ whh.T + bhh
            i, f, g, o = jnp.split(gates, 4, axis=-1)
            i, f, o = jax.nn.sigmoid(i), jax.nn.sigmoid(f), jax.nn.sigmoid(o)
            g = jnp.tanh(g)
            c = f * c + i * g
            h = o * jnp.tanh(c)
            outs.append(h)
        return jnp.stack(outs, axis=1)

    h1 = lstm_layer(feat, p['wih_l0'], p['whh_l0'], p['bih_l0'], p['bhh_l0'])
    h2 = lstm_layer(h1, p['wih_l1'], p['whh_l1'], p['bih_l1'], p['bhh_l1'])
    mu = h2.mean(-1, keepdims=True)
    var = ((h2 - mu) ** 2).mean(-1, keepdims=True)
    y = (h2 - mu) / jnp.sqrt(var + EPS) * p['ln_g'] + p['ln_b']
    y = jnp.maximum(y @ p['fc1_w'].T + p['fc1_b'], 0.0)
    return y @ p['fc2_w'].T + p['fc2_b']


if __name__ == "__main__":
    x = jax.random.normal(jax.random.PRNGKey(0), (B, T, 1, H_IMG, W_IMG), jnp.float32)
    params = init_params(jax.random.PRNGKey(42))

    out = pallas_forward(x, params)
    out = jax.block_until_ready(out)
    assert out.shape == (B, T, OUT_DIM)

    ref = ref_forward(x, params)
    np.testing.assert_allclose(np.asarray(out), np.asarray(ref), rtol=1e-2, atol=1e-3)
    print("KERNEL_OK")
</pallas_src>

<mosaic_0001>
module attributes {stable_mosaic.version = 11 : i64} {
  func.func @fused_kernel(%arg0: i32, %arg1: memref<1x256x160xf32, #tpu.memory_space<vmem>>, %arg2: memref<160x128xf32, #tpu.memory_space<vmem>>, %arg3: memref<1x128xf32, #tpu.memory_space<vmem>>, %arg4: memref<1024x32xf32, #tpu.memory_space<vmem>>, %arg5: memref<1x32xf32, #tpu.memory_space<vmem>>, %arg6: memref<32x128xf32, #tpu.memory_space<vmem>>, %arg7: memref<32x128xf32, #tpu.memory_space<vmem>>, %arg8: memref<1x128xf32, #tpu.memory_space<vmem>>, %arg9: memref<64x128xf32, #tpu.memory_space<vmem>>, %arg10: memref<1x128xf32, #tpu.memory_space<vmem>>, %arg11: memref<1x32xf32, #tpu.memory_space<vmem>>, %arg12: memref<1x32xf32, #tpu.memory_space<vmem>>, %arg13: memref<32x32xf32, #tpu.memory_space<vmem>>, %arg14: memref<1x32xf32, #tpu.memory_space<vmem>>, %arg15: memref<32x128xf32, #tpu.memory_space<vmem>>, %arg16: memref<1x128xf32, #tpu.memory_space<vmem>>, %arg17: memref<1x8x128xf32, #tpu.memory_space<vmem>>, %arg18: memref<8x32xf32, #tpu.memory_space<vmem>>) attributes {dimension_semantics = [#tpu.dimension_semantics<parallel>], iteration_bounds = array<i64: 1>, scalar_prefetch = 0 : i64, scratch_operands = 1 : i64, tpu.core_type = #tpu.core_type<tc>, window_params = [{transform_indices = @transform_0, window_bounds = array<i64: 1, 256, 160>}, {pipeline_mode = #tpu.pipeline_mode<synchronous>, transform_indices = @transform_1, window_bounds = array<i64: 160, 128>}, {pipeline_mode = #tpu.pipeline_mode<synchronous>, transform_indices = @transform_2, window_bounds = array<i64: 1, 128>}, {pipeline_mode = #tpu.pipeline_mode<synchronous>, transform_indices = @transform_3, window_bounds = array<i64: 1024, 32>}, {pipeline_mode = #tpu.pipeline_mode<synchronous>, transform_indices = @transform_4, window_bounds = array<i64: 1, 32>}, {pipeline_mode = #tpu.pipeline_mode<synchronous>, transform_indices = @transform_5, window_bounds = array<i64: 32, 128>}, {pipeline_mode = #tpu.pipeline_mode<synchronous>, transform_indices = @transform_6, window_bounds = array<i64: 32, 128>}, {pipeline_mode = #tpu.pipeline_mode<synchronous>, transform_indices = @transform_7, window_bounds = array<i64: 1, 128>}, {pipeline_mode = #tpu.pipeline_mode<synchronous>, transform_indices = @transform_8, window_bounds = array<i64: 64, 128>}, {pipeline_mode = #tpu.pipeline_mode<synchronous>, transform_indices = @transform_9, window_bounds = array<i64: 1, 128>}, {pipeline_mode = #tpu.pipeline_mode<synchronous>, transform_indices = @transform_10, window_bounds = array<i64: 1, 32>}, {pipeline_mode = #tpu.pipeline_mode<synchronous>, transform_indices = @transform_11, window_bounds = array<i64: 1, 32>}, {pipeline_mode = #tpu.pipeline_mode<synchronous>, transform_indices = @transform_12, window_bounds = array<i64: 32, 32>}, {pipeline_mode = #tpu.pipeline_mode<synchronous>, transform_indices = @transform_13, window_bounds = array<i64: 1, 32>}, {pipeline_mode = #tpu.pipeline_mode<synchronous>, transform_indices = @transform_14, window_bounds = array<i64: 32, 128>}, {pipeline_mode = #tpu.pipeline_mode<synchronous>, transform_indices = @transform_15, window_bounds = array<i64: 1, 128>}, {transform_indices = @transform_16, window_bounds = array<i64: 1, 8, 128>}]} {
    %c0 = arith.constant 0 : index
    %c0_0 = arith.constant 0 : index
    %c0_1 = arith.constant 0 : index
    %0 = vector.load %arg1[%c0, %c0_0, %c0_1] : memref<1x256x160xf32, #tpu.memory_space<vmem>>, vector<1x256x160xf32>
    %1 = vector.shape_cast %0 : vector<1x256x160xf32> to vector<256x160xf32>
    %c0_2 = arith.constant 0 : index
    %c0_3 = arith.constant 0 : index
    %2 = vector.load %arg2[%c0_2, %c0_3] : memref<160x128xf32, #tpu.memory_space<vmem>>, vector<160x128xf32>
    %cst = arith.constant dense<0.000000e+00> : vector<256x128xf32>
    %3 = tpu.matmul %1, %2, %cst {dimension_numbers = #tpu.dot_dimension_numbers<[1], [0], [0], [1], [0, 0, 1, 1], [], []>} : vector<256x160xf32>, vector<160x128xf32>, vector<256x128xf32> -> vector<256x128xf32>
    %c0_4 = arith.constant 0 : index
    %c0_5 = arith.constant 0 : index
    %4 = vector.load %arg3[%c0_4, %c0_5] : memref<1x128xf32, #tpu.memory_space<vmem>>, vector<1x128xf32>
    %5 = vector.broadcast %4 : vector<1x128xf32> to vector<256x128xf32>
    %6 = arith.addf %3, %5 : vector<256x128xf32>
    %cst_6 = arith.constant 0.000000e+00 : f32
    %7 = vector.broadcast %cst_6 : f32 to vector<256x128xf32>
    %8 = arith.maximumf %6, %7 : vector<256x128xf32>
    %9 = vector.extract_strided_slice %8 {offsets = [0, 0], sizes = [64, 128], strides = [1, 1]} : vector<256x128xf32> to vector<64x128xf32>
    %10 = vector.extract_strided_slice %8 {offsets = [64, 0], sizes = [64, 128], strides = [1, 1]} : vector<256x128xf32> to vector<64x128xf32>
    %11 = arith.maximumf %9, %10 : vector<64x128xf32>
    %12 = vector.extract_strided_slice %8 {offsets = [128, 0], sizes = [64, 128], strides = [1, 1]} : vector<256x128xf32> to vector<64x128xf32>
    %13 = vector.extract_strided_slice %8 {offsets = [192, 0], sizes = [64, 128], strides = [1, 1]} : vector<256x128xf32> to vector<64x128xf32>
    %14 = arith.maximumf %12, %13 : vector<64x128xf32>
    %15 = arith.maximumf %11, %14 : vector<64x128xf32>
    %16 = vector.extract_strided_slice %15 {offsets = [0, 0], sizes = [8, 128], strides = [1, 1]} : vector<64x128xf32> to vector<8x128xf32>
    %17 = vector.extract_strided_slice %15 {offsets = [8, 0], sizes = [8, 128], strides = [1, 1]} : vector<64x128xf32> to vector<8x128xf32>
    %18 = vector.extract_strided_slice %15 {offsets = [16, 0], sizes = [8, 128], strides = [1, 1]} : vector<64x128xf32> to vector<8x128xf32>
    %19 = vector.extract_strided_slice %15 {offsets = [24, 0], sizes = [8, 128], strides = [1, 1]} : vector<64x128xf32> to vector<8x128xf32>
    %20 = vector.extract_strided_slice %15 {offsets = [32, 0], sizes = [8, 128], strides = [1, 1]} : vector<64x128xf32> to vector<8x128xf32>
    %21 = vector.extract_strided_slice %15 {offsets = [40, 0], sizes = [8, 128], strides = [1, 1]} : vector<64x128xf32> to vector<8x128xf32>
    %22 = vector.extract_strided_slice %15 {offsets = [48, 0], sizes = [8, 128], strides = [1, 1]} : vector<64x128xf32> to vector<8x128xf32>
    %23 = vector.extract_strided_slice %15 {offsets = [56, 0], sizes = [8, 128], strides = [1, 1]} : vector<64x128xf32> to vector<8x128xf32>
    %24 = tpu.concatenate %16, %17, %18, %19, %20, %21, %22, %23 in 1 : vector<8x128xf32>, vector<8x128xf32>, vector<8x128xf32>, vector<8x128xf32>, vector<8x128xf32>, vector<8x128xf32>, vector<8x128xf32>, vector<8x128xf32> -> vector<8x1024xf32>
    %c0_7 = arith.constant 0 : index
    %c0_8 = arith.constant 0 : index
    %25 = vector.load %arg4[%c0_7, %c0_8] : memref<1024x32xf32, #tpu.memory_space<vmem>>, vector<1024x32xf32>
    %cst_9 = arith.constant dense<0.000000e+00> : vector<8x32xf32>
    %26 = tpu.matmul %24, %25, %cst_9 {dimension_numbers = #tpu.dot_dimension_numbers<[1], [0], [0], [1], [0, 0, 1, 1], [], []>} : vector<8x1024xf32>, vector<1024x32xf32>, vector<8x32xf32> -> vector<8x32xf32>
    %c0_10 = arith.constant 0 : index
    %c0_11 = arith.constant 0 : index
    %27 = vector.load %arg5[%c0_10, %c0_11] : memref<1x32xf32, #tpu.memory_space<vmem>>, vector<1x32xf32>
    %28 = vector.broadcast %27 : vector<1x32xf32> to vector<8x32xf32>
    %29 = arith.addf %26, %28 : vector<8x32xf32>
    %c0_12 = arith.constant 0 : index
    %c0_13 = arith.constant 0 : index
    %30 = vector.load %arg6[%c0_12, %c0_13] : memref<32x128xf32, #tpu.memory_space<vmem>>, vector<32x128xf32>
    %cst_14 = arith.constant dense<0.000000e+00> : vector<8x128xf32>
    %31 = tpu.matmul %29, %30, %cst_14 {dimension_numbers = #tpu.dot_dimension_numbers<[1], [0], [0], [1], [0, 0, 1, 1], [], []>} : vector<8x32xf32>, vector<32x128xf32>, vector<8x128xf32> -> vector<8x128xf32>
    %c0_15 = arith.constant 0 : index
    %c0_16 = arith.constant 0 : index
    %32 = vector.load %arg8[%c0_15, %c0_16] : memref<1x128xf32, #tpu.memory_space<vmem>>, vector<1x128xf32>
    %33 = vector.broadcast %32 : vector<1x128xf32> to vector<8x128xf32>
    %34 = arith.addf %31, %33 : vector<8x128xf32>
    %c0_17 = arith.constant 0 : index
    %c0_18 = arith.constant 0 : index
    %35 = vector.load %arg7[%c0_17, %c0_18] : memref<32x128xf32, #tpu.memory_space<vmem>>, vector<32x128xf32>
    %c0_19 = arith.constant 0 : index
    %c0_20 = arith.constant 0 : index
    %36 = vector.load %arg9[%c0_19, %c0_20] : memref<64x128xf32, #tpu.memory_space<vmem>>, vector<64x128xf32>
    %c0_21 = arith.constant 0 : index
    %c0_22 = arith.constant 0 : index
    %37 = vector.load %arg10[%c0_21, %c0_22] : memref<1x128xf32, #tpu.memory_space<vmem>>, vector<1x128xf32>
    %38 = tpu.iota {dimensions = array<i32: 1>} : vector<1x128xi32>
    %c64_i32 = arith.constant 64 : i32
    %39 = vector.broadcast %c64_i32 : i32 to vector<1x128xi32>
    %40 = arith.cmpi sge, %38, %39 : vector<1x128xi32>
    %c96_i32 = arith.constant 96 : i32
    %41 = vector.broadcast %c96_i32 : i32 to vector<1x128xi32>
    %42 = arith.cmpi slt, %38, %41 : vector<1x128xi32>
    %43 = arith.andi %40, %42 : vector<1x128xi1>
    %cst_23 = arith.constant 1.000000e+00 : f32
    %cst_24 = arith.constant 5.000000e-01 : f32
    %44 = vector.broadcast %cst_23 : f32 to vector<1x128xf32>
    %45 = vector.broadcast %cst_24 : f32 to vector<1x128xf32>
    %46 = arith.select %43, %44, %45 : vector<1x128xi1>, vector<1x128xf32>
    %cst_25 = arith.constant 0.000000e+00 : f32
    %cst_26 = arith.constant 5.000000e-01 : f32
    %47 = vector.broadcast %cst_25 : f32 to vector<1x128xf32>
    %48 = vector.broadcast %cst_26 : f32 to vector<1x128xf32>
    %49 = arith.select %43, %47, %48 : vector<1x128xi1>, vector<1x128xf32>
    %cst_27 = arith.constant 0.000000e+00 : f32
    %50 = vector.broadcast %cst_27 : f32 to vector<2x32xf32>
    %51 = vector.extract_strided_slice %34 {offsets = [0, 0], sizes = [2, 128], strides = [1, 1]} : vector<8x128xf32> to vector<2x128xf32>
    %cst_28 = arith.constant dense<0.000000e+00> : vector<2x128xf32>
    %52 = tpu.matmul %50, %35, %cst_28 {dimension_numbers = #tpu.dot_dimension_numbers<[1], [0], [0], [1], [0, 0, 1, 1], [], []>} : vector<2x32xf32>, vector<32x128xf32>, vector<2x128xf32> -> vector<2x128xf32>
    %53 = arith.addf %51, %52 : vector<2x128xf32>
    %54 = vector.broadcast %46 : vector<1x128xf32> to vector<2x128xf32>
    %55 = arith.mulf %53, %54 : vector<2x128xf32>
    %56 = math.tanh %55 : vector<2x128xf32>
    %57 = vector.broadcast %46 : vector<1x128xf32> to vector<2x128xf32>
    %58 = arith.mulf %56, %57 : vector<2x128xf32>
    %59 = vector.broadcast %49 : vector<1x128xf32> to vector<2x128xf32>
    %60 = arith.addf %58, %59 : vector<2x128xf32>
    %61 = vector.extract_strided_slice %60 {offsets = [0, 0], sizes = [2, 32], strides = [1, 1]} : vector<2x128xf32> to vector<2x32xf32>
    %62 = vector.extract_strided_slice %60 {offsets = [0, 32], sizes = [2, 32], strides = [1, 1]} : vector<2x128xf32> to vector<2x32xf32>
    %63 = vector.extract_strided_slice %60 {offsets = [0, 64], sizes = [2, 32], strides = [1, 1]} : vector<2x128xf32> to vector<2x32xf32>
    %64 = vector.extract_strided_slice %60 {offsets = [0, 96], sizes = [2, 32], strides = [1, 1]} : vector<2x128xf32> to vector<2x32xf32>
    %65 = arith.mulf %62, %50 : vector<2x32xf32>
    %66 = arith.mulf %61, %63 : vector<2x32xf32>
    %67 = arith.addf %65, %66 : vector<2x32xf32>
    %68 = math.tanh %67 : vector<2x32xf32>
    %69 = arith.mulf %64, %68 : vector<2x32xf32>
    %70 = tpu.concatenate %69, %50 in 1 : vector<2x32xf32>, vector<2x32xf32> -> vector<2x64xf32>
    %cst_29 = arith.constant dense<0.000000e+00> : vector<2x128xf32>
    %71 = tpu.matmul %70, %36, %cst_29 {dimension_numbers = #tpu.dot_dimension_numbers<[1], [0], [0], [1], [0, 0, 1, 1], [], []>} : vector<2x64xf32>, vector<64x128xf32>, vector<2x128xf32> -> vector<2x128xf32>
    %72 = vector.broadcast %37 : vector<1x128xf32> to vector<2x128xf32>
    %73 = arith.addf %71, %72 : vector<2x128xf32>
    %74 = vector.broadcast %46 : vector<1x128xf32> to vector<2x128xf32>
    %75 = arith.mulf %73, %74 : vector<2x128xf32>
    %76 = math.tanh %75 : vector<2x128xf32>
    %77 = vector.broadcast %46 : vector<1x128xf32> to vector<2x128xf32>
    %78 = arith.mulf %76, %77 : vector<2x128xf32>
    %79 = vector.broadcast %49 : vector<1x128xf32> to vector<2x128xf32>
    %80 = arith.addf %78, %79 : vector<2x128xf32>
    %81 = vector.extract_strided_slice %80 {offsets = [0, 0], sizes = [2, 32], strides = [1, 1]} : vector<2x128xf32> to vector<2x32xf32>
    %82 = vector.extract_strided_slice %80 {offsets = [0, 32], sizes = [2, 32], strides = [1, 1]} : vector<2x128xf32> to vector<2x32xf32>
    %83 = vector.extract_strided_slice %80 {offsets = [0, 64], sizes = [2, 32], strides = [1, 1]} : vector<2x128xf32> to vector<2x32xf32>
    %84 = vector.extract_strided_slice %80 {offsets = [0, 96], sizes = [2, 32], strides = [1, 1]} : vector<2x128xf32> to vector<2x32xf32>
    %85 = arith.mulf %82, %50 : vector<2x32xf32>
    %86 = arith.mulf %81, %83 : vector<2x32xf32>
    %87 = arith.addf %85, %86 : vector<2x32xf32>
    %88 = math.tanh %87 : vector<2x32xf32>
    %89 = arith.mulf %84, %88 : vector<2x32xf32>
    %c0_30 = arith.constant 0 : index
    %c0_31 = arith.constant 0 : index
    %90 = vector.load %arg18[%c0_30, %c0_31] : memref<8x32xf32, #tpu.memory_space<vmem>>, vector<2x32xf32>
    tpu.vector_store %arg18[%c0_30, %c0_31], %89 {strides = array<i32>} : memref<8x32xf32, #tpu.memory_space<vmem>>, vector<2x32xf32>,
    %91 = vector.extract_strided_slice %34 {offsets = [2, 0], sizes = [2, 128], strides = [1, 1]} : vector<8x128xf32> to vector<2x128xf32>
    %cst_32 = arith.constant dense<0.000000e+00> : vector<2x128xf32>
    %92 = tpu.matmul %69, %35, %cst_32 {dimension_numbers = #tpu.dot_dimension_numbers<[1], [0], [0], [1], [0, 0, 1, 1], [], []>} : vector<2x32xf32>, vector<32x128xf32>, vector<2x128xf32> -> vector<2x128xf32>
    %93 = arith.addf %91, %92 : vector<2x128xf32>
    %94 = vector.broadcast %46 : vector<1x128xf32> to vector<2x128xf32>
    %95 = arith.mulf %93, %94 : vector<2x128xf32>
    %96 = math.tanh %95 : vector<2x128xf32>
    %97 = vector.broadcast %46 : vector<1x128xf32> to vector<2x128xf32>
    %98 = arith.mulf %96, %97 : vector<2x128xf32>
    %99 = vector.broadcast %49 : vector<1x128xf32> to vector<2x128xf32>
    %100 = arith.addf %98, %99 : vector<2x128xf32>
    %101 = vector.extract_strided_slice %100 {offsets = [0, 0], sizes = [2, 32], strides = [1, 1]} : vector<2x128xf32> to vector<2x32xf32>
    %102 = vector.extract_strided_slice %100 {offsets = [0, 32], sizes = [2, 32], strides = [1, 1]} : vector<2x128xf32> to vector<2x32xf32>
    %103 = vector.extract_strided_slice %100 {offsets = [0, 64], sizes = [2, 32], strides = [1, 1]} : vector<2x128xf32> to vector<2x32xf32>
    %104 = vector.extract_strided_slice %100 {offsets = [0, 96], sizes = [2, 32], strides = [1, 1]} : vector<2x128xf32> to vector<2x32xf32>
    %105 = arith.mulf %102, %67 : vector<2x32xf32>
    %106 = arith.mulf %101, %103 : vector<2x32xf32>
    %107 = arith.addf %105, %106 : vector<2x32xf32>
    %108 = math.tanh %107 : vector<2x32xf32>
    %109 = arith.mulf %104, %108 : vector<2x32xf32>
    %110 = tpu.concatenate %109, %89 in 1 : vector<2x32xf32>, vector<2x32xf32> -> vector<2x64xf32>
    %cst_33 = arith.constant dense<0.000000e+00> : vector<2x128xf32>
    %111 = tpu.matmul %110, %36, %cst_33 {dimension_numbers = #tpu.dot_dimension_numbers<[1], [0], [0], [1], [0, 0, 1, 1], [], []>} : vector<2x64xf32>, vector<64x128xf32>, vector<2x128xf32> -> vector<2x128xf32>
    %112 = vector.broadcast %37 : vector<1x128xf32> to vector<2x128xf32>
    %113 = arith.addf %111, %112 : vector<2x128xf32>
    %114 = vector.broadcast %46 : vector<1x128xf32> to vector<2x128xf32>
    %115 = arith.mulf %113, %114 : vector<2x128xf32>
    %116 = math.tanh %115 : vector<2x128xf32>
    %117 = vector.broadcast %46 : vector<1x128xf32> to vector<2x128xf32>
    %118 = arith.mulf %116, %117 : vector<2x128xf32>
    %119 = vector.broadcast %49 : vector<1x128xf32> to vector<2x128xf32>
    %120 = arith.addf %118, %119 : vector<2x128xf32>
    %121 = vector.extract_strided_slice %120 {offsets = [0, 0], sizes = [2, 32], strides = [1, 1]} : vector<2x128xf32> to vector<2x32xf32>
    %122 = vector.extract_strided_slice %120 {offsets = [0, 32], sizes = [2, 32], strides = [1, 1]} : vector<2x128xf32> to vector<2x32xf32>
    %123 = vector.extract_strided_slice %120 {offsets = [0, 64], sizes = [2, 32], strides = [1, 1]} : vector<2x128xf32> to vector<2x32xf32>
    %124 = vector.extract_strided_slice %120 {offsets = [0, 96], sizes = [2, 32], strides = [1, 1]} : vector<2x128xf32> to vector<2x32xf32>
    %125 = arith.mulf %122, %87 : vector<2x32xf32>
    %126 = arith.mulf %121, %123 : vector<2x32xf32>
    %127 = arith.addf %125, %126 : vector<2x32xf32>
    %128 = math.tanh %127 : vector<2x32xf32>
    %129 = arith.mulf %124, %128 : vector<2x32xf32>
    %c2 = arith.constant 2 : index
    %c0_34 = arith.constant 0 : index
    %130 = vector.load %arg18[%c2, %c0_34] : memref<8x32xf32, #tpu.memory_space<vmem>>, vector<2x32xf32>
    tpu.vector_store %arg18[%c2, %c0_34], %129 {strides = array<i32>} : memref<8x32xf32, #tpu.memory_space<vmem>>, vector<2x32xf32>,
    %131 = vector.extract_strided_slice %34 {offsets = [4, 0], sizes = [2, 128], strides = [1, 1]} : vector<8x128xf32> to vector<2x128xf32>
    %cst_35 = arith.constant dense<0.000000e+00> : vector<2x128xf32>
    %132 = tpu.matmul %109, %35, %cst_35 {dimension_numbers = #tpu.dot_dimension_numbers<[1], [0], [0], [1], [0, 0, 1, 1], [], []>} : vector<2x32xf32>, vector<32x128xf32>, vector<2x128xf32> -> vector<2x128xf32>
    %133 = arith.addf %131, %132 : vector<2x128xf32>
    %134 = vector.broadcast %46 : vector<1x128xf32> to vector<2x128xf32>
    %135 = arith.mulf %133, %134 : vector<2x128xf32>
    %136 = math.tanh %135 : vector<2x128xf32>
    %137 = vector.broadcast %46 : vector<1x128xf32> to vector<2x128xf32>
    %138 = arith.mulf %136, %137 : vector<2x128xf32>
    %139 = vector.broadcast %49 : vector<1x128xf32> to vector<2x128xf32>
    %140 = arith.addf %138, %139 : vector<2x128xf32>
    %141 = vector.extract_strided_slice %140 {offsets = [0, 0], sizes = [2, 32], strides = [1, 1]} : vector<2x128xf32> to vector<2x32xf32>
    %142 = vector.extract_strided_slice %140 {offsets = [0, 32], sizes = [2, 32], strides = [1, 1]} : vector<2x128xf32> to vector<2x32xf32>
    %143 = vector.extract_strided_slice %140 {offsets = [0, 64], sizes = [2, 32], strides = [1, 1]} : vector<2x128xf32> to vector<2x32xf32>
    %144 = vector.extract_strided_slice %140 {offsets = [0, 96], sizes = [2, 32], strides = [1, 1]} : vector<2x128xf32> to vector<2x32xf32>
    %145 = arith.mulf %142, %107 : vector<2x32xf32>
    %146 = arith.mulf %141, %143 : vector<2x32xf32>
    %147 = arith.addf %145, %146 : vector<2x32xf32>
    %148 = math.tanh %147 : vector<2x32xf32>
    %149 = arith.mulf %144, %148 : vector<2x32xf32>
    %150 = tpu.concatenate %149, %129 in 1 : vector<2x32xf32>, vector<2x32xf32> -> vector<2x64xf32>
    %cst_36 = arith.constant dense<0.000000e+00> : vector<2x128xf32>
    %151 = tpu.matmul %150, %36, %cst_36 {dimension_numbers = #tpu.dot_dimension_numbers<[1], [0], [0], [1], [0, 0, 1, 1], [], []>} : vector<2x64xf32>, vector<64x128xf32>, vector<2x128xf32> -> vector<2x128xf32>
    %152 = vector.broadcast %37 : vector<1x128xf32> to vector<2x128xf32>
    %153 = arith.addf %151, %152 : vector<2x128xf32>
    %154 = vector.broadcast %46 : vector<1x128xf32> to vector<2x128xf32>
    %155 = arith.mulf %153, %154 : vector<2x128xf32>
    %156 = math.tanh %155 : vector<2x128xf32>
    %157 = vector.broadcast %46 : vector<1x128xf32> to vector<2x128xf32>
    %158 = arith.mulf %156, %157 : vector<2x128xf32>
    %159 = vector.broadcast %49 : vector<1x128xf32> to vector<2x128xf32>
    %160 = arith.addf %158, %159 : vector<2x128xf32>
    %161 = vector.extract_strided_slice %160 {offsets = [0, 0], sizes = [2, 32], strides = [1, 1]} : vector<2x128xf32> to vector<2x32xf32>
    %162 = vector.extract_strided_slice %160 {offsets = [0, 32], sizes = [2, 32], strides = [1, 1]} : vector<2x128xf32> to vector<2x32xf32>
    %163 = vector.extract_strided_slice %160 {offsets = [0, 64], sizes = [2, 32], strides = [1, 1]} : vector<2x128xf32> to vector<2x32xf32>
    %164 = vector.extract_strided_slice %160 {offsets = [0, 96], sizes = [2, 32], strides = [1, 1]} : vector<2x128xf32> to vector<2x32xf32>
    %165 = arith.mulf %162, %127 : vector<2x32xf32>
    %166 = arith.mulf %161, %163 : vector<2x32xf32>
    %167 = arith.addf %165, %166 : vector<2x32xf32>
    %168 = math.tanh %167 : vector<2x32xf32>
    %169 = arith.mulf %164, %168 : vector<2x32xf32>
    %c4 = arith.constant 4 : index
    %c0_37 = arith.constant 0 : index
    %170 = vector.load %arg18[%c4, %c0_37] : memref<8x32xf32, #tpu.memory_space<vmem>>, vector<2x32xf32>
    tpu.vector_store %arg18[%c4, %c0_37], %169 {strides = array<i32>} : memref<8x32xf32, #tpu.memory_space<vmem>>, vector<2x32xf32>,
    %171 = vector.extract_strided_slice %34 {offsets = [6, 0], sizes = [2, 128], strides = [1, 1]} : vector<8x128xf32> to vector<2x128xf32>
    %cst_38 = arith.constant dense<0.000000e+00> : vector<2x128xf32>
    %172 = tpu.matmul %149, %35, %cst_38 {dimension_numbers = #tpu.dot_dimension_numbers<[1], [0], [0], [1], [0, 0, 1, 1], [], []>} : vector<2x32xf32>, vector<32x128xf32>, vector<2x128xf32> -> vector<2x128xf32>
    %173 = arith.addf %171, %172 : vector<2x128xf32>
    %174 = vector.broadcast %46 : vector<1x128xf32> to vector<2x128xf32>
    %175 = arith.mulf %173, %174 : vector<2x128xf32>
    %176 = math.tanh %175 : vector<2x128xf32>
    %177 = vector.broadcast %46 : vector<1x128xf32> to vector<2x128xf32>
    %178 = arith.mulf %176, %177 : vector<2x128xf32>
    %179 = vector.broadcast %49 : vector<1x128xf32> to vector<2x128xf32>
    %180 = arith.addf %178, %179 : vector<2x128xf32>
    %181 = vector.extract_strided_slice %180 {offsets = [0, 0], sizes = [2, 32], strides = [1, 1]} : vector<2x128xf32> to vector<2x32xf32>
    %182 = vector.extract_strided_slice %180 {offsets = [0, 32], sizes = [2, 32], strides = [1, 1]} : vector<2x128xf32> to vector<2x32xf32>
    %183 = vector.extract_strided_slice %180 {offsets = [0, 64], sizes = [2, 32], strides = [1, 1]} : vector<2x128xf32> to vector<2x32xf32>
    %184 = vector.extract_strided_slice %180 {offsets = [0, 96], sizes = [2, 32], strides = [1, 1]} : vector<2x128xf32> to vector<2x32xf32>
    %185 = arith.mulf %182, %147 : vector<2x32xf32>
    %186 = arith.mulf %181, %183 : vector<2x32xf32>
    %187 = arith.addf %185, %186 : vector<2x32xf32>
    %188 = math.tanh %187 : vector<2x32xf32>
    %189 = arith.mulf %184, %188 : vector<2x32xf32>
    %190 = tpu.concatenate %189, %169 in 1 : vector<2x32xf32>, vector<2x32xf32> -> vector<2x64xf32>
    %cst_39 = arith.constant dense<0.000000e+00> : vector<2x128xf32>
    %191 = tpu.matmul %190, %36, %cst_39 {dimension_numbers = #tpu.dot_dimension_numbers<[1], [0], [0], [1], [0, 0, 1, 1], [], []>} : vector<2x64xf32>, vector<64x128xf32>, vector<2x128xf32> -> vector<2x128xf32>
    %192 = vector.broadcast %37 : vector<1x128xf32> to vector<2x128xf32>
    %193 = arith.addf %191, %192 : vector<2x128xf32>
    %194 = vector.broadcast %46 : vector<1x128xf32> to vector<2x128xf32>
    %195 = arith.mulf %193, %194 : vector<2x128xf32>
    %196 = math.tanh %195 : vector<2x128xf32>
    %197 = vector.broadcast %46 : vector<1x128xf32> to vector<2x128xf32>
    %198 = arith.mulf %196, %197 : vector<2x128xf32>
    %199 = vector.broadcast %49 : vector<1x128xf32> to vector<2x128xf32>
    %200 = arith.addf %198, %199 : vector<2x128xf32>
    %201 = vector.extract_strided_slice %200 {offsets = [0, 0], sizes = [2, 32], strides = [1, 1]} : vector<2x128xf32> to vector<2x32xf32>
    %202 = vector.extract_strided_slice %200 {offsets = [0, 32], sizes = [2, 32], strides = [1, 1]} : vector<2x128xf32> to vector<2x32xf32>
    %203 = vector.extract_strided_slice %200 {offsets = [0, 64], sizes = [2, 32], strides = [1, 1]} : vector<2x128xf32> to vector<2x32xf32>
    %204 = vector.extract_strided_slice %200 {offsets = [0, 96], sizes = [2, 32], strides = [1, 1]} : vector<2x128xf32> to vector<2x32xf32>
    %205 = arith.mulf %202, %167 : vector<2x32xf32>
    %206 = arith.mulf %201, %203 : vector<2x32xf32>
    %207 = arith.addf %205, %206 : vector<2x32xf32>
    %208 = math.tanh %207 : vector<2x32xf32>
    %209 = arith.mulf %204, %208 : vector<2x32xf32>
    %c6 = arith.constant 6 : index
    %c0_40 = arith.constant 0 : index
    %210 = vector.load %arg18[%c6, %c0_40] : memref<8x32xf32, #tpu.memory_space<vmem>>, vector<2x32xf32>
    tpu.vector_store %arg18[%c6, %c0_40], %209 {strides = array<i32>} : memref<8x32xf32, #tpu.memory_space<vmem>>, vector<2x32xf32>,
    %c0_41 = arith.constant 0 : index
    %c0_42 = arith.constant 0 : index
    %211 = vector.load %arg18[%c0_41, %c0_42] : memref<8x32xf32, #tpu.memory_space<vmem>>, vector<8x32xf32>
    %cst_43 = arith.constant dense<0.000000e+00> : vector<8xf32>
    %212 = vector.multi_reduction <add>, %211, %cst_43 [1] : vector<8x32xf32> to vector<8xf32>
    %213 = vector.shape_cast %212 : vector<8xf32> to vector<8x1xf32>
    %cst_44 = arith.constant 3.200000e+01 : f32
    %214 = vector.broadcast %cst_44 : f32 to vector<8x1xf32>
    %215 = arith.divf %213, %214 : vector<8x1xf32>
    %216 = vector.broadcast %215 : vector<8x1xf32> to vector<8x32xf32>
    %217 = arith.subf %211, %216 : vector<8x32xf32>
    %218 = arith.mulf %217, %217 : vector<8x32xf32>
    %cst_45 = arith.constant dense<0.000000e+00> : vector<8xf32>
    %219 = vector.multi_reduction <add>, %218, %cst_45 [1] : vector<8x32xf32> to vector<8xf32>
    %220 = vector.shape_cast %219 : vector<8xf32> to vector<8x1xf32>
    %cst_46 = arith.constant 3.200000e+01 : f32
    %221 = vector.broadcast %cst_46 : f32 to vector<8x1xf32>
    %222 = arith.divf %220, %221 : vector<8x1xf32>
    %223 = vector.broadcast %215 : vector<8x1xf32> to vector<8x32xf32>
    %224 = arith.subf %211, %223 : vector<8x32xf32>
    %cst_47 = arith.constant 9.99999974E-6 : f32
    %225 = vector.broadcast %cst_47 : f32 to vector<8x1xf32>
    %226 = arith.addf %222, %225 : vector<8x1xf32>
    %227 = math.rsqrt %226 : vector<8x1xf32>
    %228 = vector.broadcast %227 : vector<8x1xf32> to vector<8x32xf32>
    %229 = arith.mulf %224, %228 : vector<8x32xf32>
    %c0_48 = arith.constant 0 : index
    %c0_49 = arith.constant 0 : index
    %230 = vector.load %arg11[%c0_48, %c0_49] : memref<1x32xf32, #tpu.memory_space<vmem>>, vector<1x32xf32>
    %231 = vector.broadcast %230 : vector<1x32xf32> to vector<8x32xf32>
    %232 = arith.mulf %229, %231 : vector<8x32xf32>
    %c0_50 = arith.constant 0 : index
    %c0_51 = arith.constant 0 : index
    %233 = vector.load %arg12[%c0_50, %c0_51] : memref<1x32xf32, #tpu.memory_space<vmem>>, vector<1x32xf32>
    %234 = vector.broadcast %233 : vector<1x32xf32> to vector<8x32xf32>
    %235 = arith.addf %232, %234 : vector<8x32xf32>
    %c0_52 = arith.constant 0 : index
    %c0_53 = arith.constant 0 : index
    %236 = vector.load %arg13[%c0_52, %c0_53] : memref<32x32xf32, #tpu.memory_space<vmem>>, vector<32x32xf32>
    %cst_54 = arith.constant dense<0.000000e+00> : vector<8x32xf32>
    %237 = tpu.matmul %235, %236, %cst_54 {dimension_numbers = #tpu.dot_dimension_numbers<[1], [0], [0], [1], [0, 0, 1, 1], [], []>} : vector<8x32xf32>, vector<32x32xf32>, vector<8x32xf32> -> vector<8x32xf32>
    %c0_55 = arith.constant 0 : index
    %c0_56 = arith.constant 0 : index
    %238 = vector.load %arg14[%c0_55, %c0_56] : memref<1x32xf32, #tpu.memory_space<vmem>>, vector<1x32xf32>
    %239 = vector.broadcast %238 : vector<1x32xf32> to vector<8x32xf32>
    %240 = arith.addf %237, %239 : vector<8x32xf32>
    %cst_57 = arith.constant 0.000000e+00 : f32
    %241 = vector.broadcast %cst_57 : f32 to vector<8x32xf32>
    %242 = arith.maximumf %240, %241 : vector<8x32xf32>
    %c0_58 = arith.constant 0 : index
    %c0_59 = arith.constant 0 : index
    %243 = vector.load %arg15[%c0_58, %c0_59] : memref<32x128xf32, #tpu.memory_space<vmem>>, vector<32x128xf32>
    %cst_60 = arith.constant dense<0.000000e+00> : vector<8x128xf32>
    %244 = tpu.matmul %242, %243, %cst_60 {dimension_numbers = #tpu.dot_dimension_numbers<[1], [0], [0], [1], [0, 0, 1, 1], [], []>} : vector<8x32xf32>, vector<32x128xf32>, vector<8x128xf32> -> vector<8x128xf32>
    %c0_61 = arith.constant 0 : index
    %c0_62 = arith.constant 0 : index
    %245 = vector.load %arg16[%c0_61, %c0_62] : memref<1x128xf32, #tpu.memory_space<vmem>>, vector<1x128xf32>
    %246 = vector.broadcast %245 : vector<1x128xf32> to vector<8x128xf32>
    %247 = arith.addf %244, %246 : vector<8x128xf32>
    %c0_63 = arith.constant 0 : index
    %c0_64 = arith.constant 0 : index
    %c0_65 = arith.constant 0 : index
    %248 = vector.load %arg17[%c0_63, %c0_64, %c0_65] : memref<1x8x128xf32, #tpu.memory_space<vmem>>, vector<1x8x128xf32>
    %249 = vector.shape_cast %248 : vector<1x8x128xf32> to vector<8x128xf32>
    %250 = vector.shape_cast %247 : vector<8x128xf32> to vector<1x8x128xf32>
    tpu.vector_store %arg17[%c0_63, %c0_64, %c0_65], %250 {strides = array<i32>} : memref<1x8x128xf32, #tpu.memory_space<vmem>>, vector<1x8x128xf32>,
    return
  }
  func.func @transform_0(%arg0: i32) -> (i32, i32, i32) {
    %c0_i32 = arith.constant 0 : i32
    %c0_i32_0 = arith.constant 0 : i32
    %c0_i32_1 = arith.constant 0 : i32
    return %arg0, %c0_i32, %c0_i32_0 : i32, i32, i32
  }
  func.func @transform_1(%arg0: i32) -> (i32, i32) {
    %c0_i32 = arith.constant 0 : i32
    %c0_i32_0 = arith.constant 0 : i32
    %c0_i32_1 = arith.constant 0 : i32
    return %c0_i32, %c0_i32_0 : i32, i32
  }
  func.func @transform_2(%arg0: i32) -> (i32, i32) {
    %c0_i32 = arith.constant 0 : i32
    %c0_i32_0 = arith.constant 0 : i32
    %c0_i32_1 = arith.constant 0 : i32
    return %c0_i32, %c0_i32_0 : i32, i32
  }
  func.func @transform_3(%arg0: i32) -> (i32, i32) {
    %c0_i32 = arith.constant 0 : i32
    %c0_i32_0 = arith.constant 0 : i32
    %c0_i32_1 = arith.constant 0 : i32
    return %c0_i32, %c0_i32_0 : i32, i32
  }
  func.func @transform_4(%arg0: i32) -> (i32, i32) {
    %c0_i32 = arith.constant 0 : i32
    %c0_i32_0 = arith.constant 0 : i32
    %c0_i32_1 = arith.constant 0 : i32
    return %c0_i32, %c0_i32_0 : i32, i32
  }
  func.func @transform_5(%arg0: i32) -> (i32, i32) {
    %c0_i32 = arith.constant 0 : i32
    %c0_i32_0 = arith.constant 0 : i32
    %c0_i32_1 = arith.constant 0 : i32
    return %c0_i32, %c0_i32_0 : i32, i32
  }
  func.func @transform_6(%arg0: i32) -> (i32, i32) {
    %c0_i32 = arith.constant 0 : i32
    %c0_i32_0 = arith.constant 0 : i32
    %c0_i32_1 = arith.constant 0 : i32
    return %c0_i32, %c0_i32_0 : i32, i32
  }
  func.func @transform_7(%arg0: i32) -> (i32, i32) {
    %c0_i32 = arith.constant 0 : i32
    %c0_i32_0 = arith.constant 0 : i32
    %c0_i32_1 = arith.constant 0 : i32
    return %c0_i32, %c0_i32_0 : i32, i32
  }
  func.func @transform_8(%arg0: i32) -> (i32, i32) {
    %c0_i32 = arith.constant 0 : i32
    %c0_i32_0 = arith.constant 0 : i32
    %c0_i32_1 = arith.constant 0 : i32
    return %c0_i32, %c0_i32_0 : i32, i32
  }
  func.func @transform_9(%arg0: i32) -> (i32, i32) {
    %c0_i32 = arith.constant 0 : i32
    %c0_i32_0 = arith.constant 0 : i32
    %c0_i32_1 = arith.constant 0 : i32
    return %c0_i32, %c0_i32_0 : i32, i32
  }
  func.func @transform_10(%arg0: i32) -> (i32, i32) {
    %c0_i32 = arith.constant 0 : i32
    %c0_i32_0 = arith.constant 0 : i32
    %c0_i32_1 = arith.constant 0 : i32
    return %c0_i32, %c0_i32_0 : i32, i32
  }
  func.func @transform_11(%arg0: i32) -> (i32, i32) {
    %c0_i32 = arith.constant 0 : i32
    %c0_i32_0 = arith.constant 0 : i32
    %c0_i32_1 = arith.constant 0 : i32
    return %c0_i32, %c0_i32_0 : i32, i32
  }
  func.func @transform_12(%arg0: i32) -> (i32, i32) {
    %c0_i32 = arith.constant 0 : i32
    %c0_i32_0 = arith.constant 0 : i32
    %c0_i32_1 = arith.constant 0 : i32
    return %c0_i32, %c0_i32_0 : i32, i32
  }
  func.func @transform_13(%arg0: i32) -> (i32, i32) {
    %c0_i32 = arith.constant 0 : i32
    %c0_i32_0 = arith.constant 0 : i32
    %c0_i32_1 = arith.constant 0 : i32
    return %c0_i32, %c0_i32_0 : i32, i32
  }
  func.func @transform_14(%arg0: i32) -> (i32, i32) {
    %c0_i32 = arith.constant 0 : i32
    %c0_i32_0 = arith.constant 0 : i32
    %c0_i32_1 = arith.constant 0 : i32
    return %c0_i32, %c0_i32_0 : i32, i32
  }
  func.func @transform_15(%arg0: i32) -> (i32, i32) {
    %c0_i32 = arith.constant 0 : i32
    %c0_i32_0 = arith.constant 0 : i32
    %c0_i32_1 = arith.constant 0 : i32
    return %c0_i32, %c0_i32_0 : i32, i32
  }
  func.func @transform_16(%arg0: i32) -> (i32, i32, i32) {
    %c0_i32 = arith.constant 0 : i32
    %c0_i32_0 = arith.constant 0 : i32
    %c0_i32_1 = arith.constant 0 : i32
    return %arg0, %c0_i32, %c0_i32_0 : i32, i32, i32
  }
}

</mosaic_0001>

<bundles_post_ra>
// kernel: pallas_forward.1
= control target key start
LH: loop header
LB: loop body
LE: loop exit
PB: predicated region body
PF: predicated region fallthrough
CT: control target
= control target key end

     0   :  { %vm141_vm0 = vcmask 261120   ;;  %vm916_vm4 = vcmask 523264   ;;  %vm965_vm5 = vcmask 254976   ;;  %s2715_s1 = inlined_call_operand.vmem [shape: f32[160,128], index: 1, kind: input, shape index: {}]   ;;  %s2716_s0 = inlined_call_operand.vmem [shape: f32[1,256,160], index: 0, kind: input, shape index: {}]   ;;  %s2717_s2 = inlined_call_operand.vmem [shape: f32[1,128], index: 2, kind: input, shape index: {}]   ;;  %s2718_s3 = inlined_call_operand.vmem [shape: f32[1024,32], index: 3, kind: input, shape index: {}]   ;;  %s2719_s4 = inlined_call_operand.vmem [shape: f32[1,32], index: 4, kind: input, shape index: {}]   ;;  %s2720_s7 = inlined_call_operand.vmem [shape: f32[1,128], index: 7, kind: input, shape index: {}]   ;;  %s2721_s5 = inlined_call_operand.vmem [shape: f32[32,128], index: 5, kind: input, shape index: {}]   ;;  %s2722_s6 = inlined_call_operand.vmem [shape: f32[32,128], index: 6, kind: input, shape index: {}]   ;;  %s2723_s8 = inlined_call_operand.vmem [shape: f32[64,128], index: 8, kind: input, shape index: {}]   ;;  %s2724_s9 = inlined_call_operand.vmem [shape: f32[1,128], index: 9, kind: input, shape index: {}]   ;;  %s2725_s10 = inlined_call_operand.vmem [shape: f32[1,32], index: 10, kind: input, shape index: {}]   ;;  %s2726_s11 = inlined_call_operand.vmem [shape: f32[1,32], index: 11, kind: input, shape index: {}]   ;;  %s2727_s13 = inlined_call_operand.vmem [shape: f32[1,32], index: 13, kind: input, shape index: {}]   ;;  %s2728_s12 = inlined_call_operand.vmem [shape: f32[32,32], index: 12, kind: input, shape index: {}]   ;;  %s2729_s14 = inlined_call_operand.vmem [shape: f32[32,128], index: 14, kind: input, shape index: {}]   ;;  %s2730_s15 = inlined_call_operand.vmem [shape: f32[1,128], index: 15, kind: input, shape index: {}]   ;;  %s2731_s16 = inlined_call_operand.vmem [shape: f32[1,8,128], index: 16, kind: output, shape index: {}]  }
   0x1   :  { %2733 = sst [smem:[#allocation3_spill]] %s2715_s1  ;;  %v54_v8 = vld [vmem:[%s2716_s0 + $0x8] sm:$0xff]  ;;  %v56_v13 = vld [vmem:[%s2716_s0 + $0x18] sm:$0xff]  ;;  %v53_v23 = vld [vmem:[%s2716_s0] sm:$0xff] }
   0x2   :  { %s2734_s23 = sld [smem:[#allocation3_spill]]  ;;  %v58_v18 = vld [vmem:[%s2716_s0 + $0x28] sm:$0xff]  ;;  %v60_v24 = vld [vmem:[%s2716_s0 + $0x38] sm:$0xff]  ;;  %v55_v25 = vld [vmem:[%s2716_s0 + $0x10] sm:$0xff] }
   0x3   :  { %v62_v26 = vld [vmem:[%s2716_s0 + $0x48] sm:$0xff]  ;;  %v57_v27 = vld [vmem:[%s2716_s0 + $0x20] sm:$0xff]  ;;  %v64_v28 = vld [vmem:[%s2716_s0 + $0x58] sm:$0xff] }
   0x4   :  { %v59_v29 = vld [vmem:[%s2716_s0 + $0x30] sm:$0xff]  ;;  %v66_v30 = vld [vmem:[%s2716_s0 + $0x68] sm:$0xff]  ;;  %v61_v31 = vld [vmem:[%s2716_s0 + $0x40] sm:$0xff] }
   0x5   :  { %v68_v32 = vld [vmem:[%s2716_s0 + $0x78] sm:$0xff]  ;;  %v63_v33 = vld [vmem:[%s2716_s0 + $0x50] sm:$0xff]  ;;  %v70_v34 = vld [vmem:[%s2716_s0 + $0x88] sm:$0xff] }
   0x6   :  { %v65_v35 = vld [vmem:[%s2716_s0 + $0x60] sm:$0xff]  ;;  %v72_v36 = vld [vmem:[%s2716_s0 + $0x98] sm:$0xff]  ;;  %v67_v37 = vld [vmem:[%s2716_s0 + $0x70] sm:$0xff] }
   0x7   :  { %v74_v38 = vld [vmem:[%s2716_s0 + $0xa8] sm:$0xff]  ;;  %v69_v39 = vld [vmem:[%s2716_s0 + $0x80] sm:$0xff]  ;;  %v76_v40 = vld [vmem:[%s2716_s0 + $0xb8] sm:$0xff] }
   0x8   :  { %v132_v0 = vld [vmem:[%s2734_s23 + $0x78] sm:$0xff]  ;;  %v131_v2 = vld [vmem:[%s2734_s23 + $0x70] sm:$0xff]  ;;  %v130_v4 = vld [vmem:[%s2734_s23 + $0x68] sm:$0xff] }
   0x9   :  { %v136_v1 = vld [vmem:[%s2734_s23 + $0x98] sm:$0xff]  ;;  %238 = vmatpush.msra.mxu0 %v132_v0  ;;  %v135_v3 = vld [vmem:[%s2734_s23 + $0x90] sm:$0xff]  ;;  %v134_v5 = vld [vmem:[%s2734_s23 + $0x88] sm:$0xff]  ;;  %1450 = vmatpush.msra.mxu3 %v132_v0 }
   0xa   :  { %363 = vmatpush.msra.mxu1 %v136_v1  ;;  %1466 = vmatpush.msra.mxu2 %v136_v1  ;;  %v129_v6 = vld [vmem:[%s2734_s23 + $0x60] sm:$0xff]  ;;  %v128_v9 = vld [vmem:[%s2734_s23 + $0x58] sm:$0xff]  ;;  %v127_v10 = vld [vmem:[%s2734_s23 + $0x50] sm:$0xff] }
   0xb   :  { %239 = vmatpush.msra.mxu0 %v131_v2  ;;  %v133_v7 = vld [vmem:[%s2734_s23 + $0x80] sm:$0xff]  ;;  %1451 = vmatpush.msra.mxu3 %v131_v2  ;;  %v126_v11 = vld [vmem:[%s2734_s23 + $0x48] sm:$0xff]  ;;  %v124_v14 = vld [vmem:[%s2734_s23 + $0x38] sm:$0xff] }
   0xc   :  { %364 = vmatpush.msra.mxu1 %v135_v3  ;;  %1467 = vmatpush.msra.mxu2 %v135_v3  ;;  %v125_v12 = vld [vmem:[%s2734_s23 + $0x40] sm:$0xff]  ;;  %v123_v15 = vld [vmem:[%s2734_s23 + $0x30] sm:$0xff]  ;;  %v122_v16 = vld [vmem:[%s2734_s23 + $0x28] sm:$0xff] }
   0xd   :  { %240 = vmatpush.msra.mxu0 %v130_v4  ;;  %1452 = vmatpush.msra.mxu3 %v130_v4  ;;  %v121_v17 = vld [vmem:[%s2734_s23 + $0x20] sm:$0xff]  ;;  %v120_v19 = vld [vmem:[%s2734_s23 + $0x18] sm:$0xff]  ;;  %v119_v20 = vld [vmem:[%s2734_s23 + $0x10] sm:$0xff] }
   0xe   :  { %365 = vmatpush.msra.mxu1 %v134_v5  ;;  %1468 = vmatpush.msra.mxu2 %v134_v5  ;;  %v118_v21 = vld [vmem:[%s2734_s23 + $0x8] sm:$0xff]  ;;  %v117_v22 = vld [vmem:[%s2734_s23] sm:$0xff]  ;;  %v71_v41 = vld [vmem:[%s2716_s0 + $0x90] sm:$0xff] }
   0xf   :  { %241 = vmatpush.msra.mxu0 %v129_v6  ;;  %1453 = vmatpush.msra.mxu3 %v129_v6  ;;  %v78_v42 = vld [vmem:[%s2716_s0 + $0xc8] sm:$0xff]  ;;  %v73_v43 = vld [vmem:[%s2716_s0 + $0xa0] sm:$0xff]  ;;  %v80_v44 = vld [vmem:[%s2716_s0 + $0xd8] sm:$0xff] }
  0x10   :  { %366 = vmatpush.msra.mxu1 %v133_v7  ;;  %1469 = vmatpush.msra.mxu2 %v133_v7  ;;  %v75_v45 = vld [vmem:[%s2716_s0 + $0xb0] sm:$0xff]  ;;  %v82_v46 = vld [vmem:[%s2716_s0 + $0xe8] sm:$0xff]  ;;  %v77_v47 = vld [vmem:[%s2716_s0 + $0xc0] sm:$0xff] }
  0x11   :  { %1408 = vmatmul.msk.f32.vlgmr.msra.gmra.mxu1 %vm141_vm0, %v54_v8  ;;  %242 = vmatpush.msra.mxu0 %v128_v9  ;;  %v84_v48 = vld [vmem:[%s2716_s0 + $0xf8] sm:$0xff]  ;;  %v79_v50 = vld [vmem:[%s2716_s0 + $0xd0] sm:$0xff]  ;;  %v86_v51 = vld [vmem:[%s2716_s0 + $0x108] sm:$0xff] }
  0x12   :  { %1454 = vmatpush.msra.mxu3 %v128_v9  ;;  %v105_v52 = vld [vmem:[%s2716_s0 + $0x1a0] sm:$0xff]  ;;  %v88_v55 = vld [vmem:[%s2716_s0 + $0x118] sm:$0xff]  ;;  %v107_v56 = vld [vmem:[%s2716_s0 + $0x1b0] sm:$0xff] }
  0x13   :  { %243 = vmatpush.msra.mxu0 %v127_v10  ;;  %v81_v54 = vld [vmem:[%s2716_s0 + $0xe0] sm:$0xff]  ;;  %v83_v58 = vld [vmem:[%s2716_s0 + $0xf0] sm:$0xff]  ;;  %v90_v59 = vld [vmem:[%s2716_s0 + $0x128] sm:$0xff] }
  0x14   :  { %1455 = vmatpush.msra.mxu3 %v127_v10  ;;  %v109_v60 = vld [vmem:[%s2716_s0 + $0x1c0] sm:$0xff]  ;;  %v110_v61 = vld [vmem:[%s2716_s0 + $0x1c8] sm:$0xff]  ;;  %v92_v1 = vld [vmem:[%s2716_s0 + $0x138] sm:$0xff] }
  0x15   :  { %244 = vmatpush.msra.mxu0 %v126_v11  ;;  %1436 = vmatmul.msk.f32.vlgmr.msra.gmra.mxu2 %vm141_vm0, %v110_v61  ;;  %v85_v0 = vld [vmem:[%s2716_s0 + $0x100] sm:$0xff]  ;;  %v111_v2 = vld [vmem:[%s2716_s0 + $0x1d0] sm:$0xff]  ;;  %v112_v3 = vld [vmem:[%s2716_s0 + $0x1d8] sm:$0xff] }
  0x16   :  { %1456 = vmatpush.msra.mxu3 %v126_v11  ;;  %v87_v6 = vld [vmem:[%s2716_s0 + $0x110] sm:$0xff]  ;;  %v94_v7 = vld [vmem:[%s2716_s0 + $0x148] sm:$0xff]  ;;  %v113_v8 = vld [vmem:[%s2716_s0 + $0x1e0] sm:$0xff] }
  0x17   :  { %245 = vmatpush.msra.mxu0 %v125_v12  ;;  %v114_v9 = vld [vmem:[%s2716_s0 + $0x1e8] sm:$0xff]  ;;  %v1845_v10 = vld [vmem:[%s2717_s2] ss:$0 sm:$0xff] }
  0x18   :  { %1457 = vmatpush.msra.mxu3 %v125_v12 }
  0x19   :  { %1409 = vmatmul.msk.f32.gmra.mxu1 %vm141_vm0, %v56_v13  ;;  %246 = vmatpush.msra.mxu0 %v124_v14  ;;  %v89_v13 = vld [vmem:[%s2716_s0 + $0x120] sm:$0xff] }
  0x1a   :  { %1458 = vmatpush.msra.mxu3 %v124_v14  ;;  %v96_v14 = vld [vmem:[%s2716_s0 + $0x158] sm:$0xff] }
  0x1b   :  { %247 = vmatpush.msra.mxu0 %v123_v15 }
  0x1c   :  { %1459 = vmatpush.msra.mxu3 %v123_v15 }
  0x1d   :  { %248 = vmatpush.msra.mxu0 %v122_v16  ;;  %1437 = vmatmul.msk.f32.gmra.mxu2 %vm141_vm0, %v112_v3 }
  0x1e   :  { %1460 = vmatpush.msra.mxu3 %v122_v16 }
  0x1f   :  { %249 = vmatpush.msra.mxu0 %v121_v17 }
  0x20   :  { %1461 = vmatpush.msra.mxu3 %v121_v17  ;;  %v115_v17 = vld [vmem:[%s2716_s0 + $0x1f0] sm:$0xff] }
  0x21   :  { %1410 = vmatmul.msk.f32.gmra.mxu1 %vm141_vm0, %v58_v18  ;;  %250 = vmatpush.msra.mxu0 %v120_v19  ;;  %v116_v18 = vld [vmem:[%s2716_s0 + $0x1f8] sm:$0xff] }
  0x22   :  { %1462 = vmatpush.msra.mxu3 %v120_v19 }
  0x23   :  { %251 = vmatpush.msra.mxu0 %v119_v20 }
  0x24   :  { %1463 = vmatpush.msra.mxu3 %v119_v20 }
  0x25   :  { %252 = vmatpush.msra.mxu0 %v118_v21  ;;  %1438 = vmatmul.msk.f32.gmra.mxu2 %vm141_vm0, %v114_v9 }
  0x26   :  { %1464 = vmatpush.msra.mxu3 %v118_v21  ;;  %v91_v21 = vld [vmem:[%s2716_s0 + $0x130] sm:$0xff] }
  0x27   :  { %253 = vmatpush.msra.mxu0 %v117_v22 }
  0x28   :  { %254 = vmatmul.f32.vlgmr.msra.gmra.mxu0 %v53_v23  ;;  %1465 = vmatpush.msra.mxu3 %v117_v22  ;;  %v98_v22 = vld [vmem:[%s2716_s0 + $0x168] sm:$0xff] }
  0x29   :  { %1411 = vmatmul.msk.f32.gmra.mxu1 %vm141_vm0, %v60_v24  ;;  %332 = vmatmul.f32.vlgmr.msra.gmra.mxu3 %v105_v52 }
  0x2d   :  { %1439 = vmatmul.msk.f32.gmra.mxu2 %vm141_vm0, %v116_v18 }
  0x30   :  { %257 = vmatmul.f32.gmra.mxu0 %v55_v25 }
  0x31   :  { %1412 = vmatmul.msk.f32.gmra.mxu1 %vm141_vm0, %v62_v26  ;;  %335 = vmatmul.f32.gmra.mxu3 %v107_v56 }
  0x38   :  { %260 = vmatmul.f32.gmra.mxu0 %v57_v27  ;;  %v93_v27 = vld [vmem:[%s2716_s0 + $0x140] sm:$0xff] }
  0x39   :  { %1413 = vmatmul.msk.f32.gmra.mxu1 %vm141_vm0, %v64_v28  ;;  %338 = vmatmul.f32.gmra.mxu3 %v109_v60  ;;  %v100_v28 = vld [vmem:[%s2716_s0 + $0x178] sm:$0xff] }
  0x40   :  { %263 = vmatmul.f32.gmra.mxu0 %v59_v29 }
  0x41   :  { %1414 = vmatmul.msk.f32.gmra.mxu1 %vm141_vm0, %v66_v30  ;;  %341 = vmatmul.f32.gmra.mxu3 %v111_v2 }
  0x48   :  { %266 = vmatmul.f32.gmra.mxu0 %v61_v31 }
  0x49   :  { %1415 = vmatmul.msk.f32.gmra.mxu1 %vm141_vm0, %v68_v32  ;;  %344 = vmatmul.f32.gmra.mxu3 %v113_v8 }
  0x50   :  { %269 = vmatmul.f32.gmra.mxu0 %v63_v33  ;;  %v95_v33 = vld [vmem:[%s2716_s0 + $0x150] sm:$0xff] }
  0x51   :  { %1416 = vmatmul.msk.f32.gmra.mxu1 %vm141_vm0, %v70_v34  ;;  %347 = vmatmul.f32.gmra.mxu3 %v115_v17  ;;  %v102_v34 = vld [vmem:[%s2716_s0 + $0x188] sm:$0xff] }
  0x58   :  { %272 = vmatmul.f32.gmra.mxu0 %v65_v35 }
  0x59   :  { %1417 = vmatmul.msk.f32.gmra.mxu1 %vm141_vm0, %v72_v36 }
  0x60   :  { %275 = vmatmul.f32.gmra.mxu0 %v67_v37 }
  0x61   :  { %1418 = vmatmul.msk.f32.gmra.mxu1 %vm141_vm0, %v74_v38 }
  0x68   :  { %278 = vmatmul.f32.gmra.mxu0 %v69_v39  ;;  %v97_v39 = vld [vmem:[%s2716_s0 + $0x160] sm:$0xff] }
  0x69   :  { %1419 = vmatmul.msk.f32.gmra.mxu1 %vm141_vm0, %v76_v40  ;;  %v104_v40 = vld [vmem:[%s2716_s0 + $0x198] sm:$0xff] }
  0x70   :  { %281 = vmatmul.f32.gmra.mxu0 %v71_v41 }
  0x71   :  { %1420 = vmatmul.msk.f32.gmra.mxu1 %vm141_vm0, %v78_v42 }
  0x78   :  { %284 = vmatmul.f32.gmra.mxu0 %v73_v43 }
  0x79   :  { %1421 = vmatmul.msk.f32.gmra.mxu1 %vm141_vm0, %v80_v44 }
  0x80   :  { %287 = vmatmul.f32.gmra.mxu0 %v75_v45  ;;  %v99_v45 = vld [vmem:[%s2716_s0 + $0x170] sm:$0xff] }
  0x81   :  { %1422 = vmatmul.msk.f32.gmra.mxu1 %vm141_vm0, %v82_v46  ;;  %v106_v46 = vld [vmem:[%s2716_s0 + $0x1a8] sm:$0xff] }
  0x88   :  { %290 = vmatmul.f32.gmra.mxu0 %v77_v47 }
  0x89   :  { %1423 = vmatmul.msk.f32.gmra.mxu1 %vm141_vm0, %v84_v48 }
  0x8e   :  { %v1772_v49 = vpop.f32.mrf.mxu1 }
  0x90   :  { %293 = vmatmul.f32.gmra.mxu0 %v79_v50 }
  0x91   :  { %1424 = vmatmul.msk.f32.gmra.mxu1 %vm141_vm0, %v86_v51 }
  0x96   :  { %v1784_v53 = vpop.f32.mrf.mxu1 }
  0x98   :  { %296 = vmatmul.f32.gmra.mxu0 %v81_v54  ;;  %v101_v54 = vld [vmem:[%s2716_s0 + $0x180] sm:$0xff] }
  0x99   :  { %1425 = vmatmul.msk.f32.gmra.mxu1 %vm141_vm0, %v88_v55  ;;  %v108_v55 = vld [vmem:[%s2716_s0 + $0x1b8] sm:$0xff] }
  0x9e   :  { %v374_v57 = vpop.f32.mrf.mxu1 }
  0xa0   :  { %299 = vmatmul.f32.gmra.mxu0 %v83_v58 }
  0xa1   :  { %1426 = vmatmul.msk.f32.gmra.mxu1 %vm141_vm0, %v90_v59 }
  0xa5   :  { %v1810_v62 = vpop.f32.mrf.mxu0 }
  0xa6   :  { %v377_v63 = vpop.f32.mrf.mxu1  ;;  %v256_v50 = vadd.f32 %v1845_v10, %v1810_v62 }
  0xa8   :  { %302 = vmatmul.f32.gmra.mxu0 %v85_v0  ;;  %v369_v56 = vadd.f32 %v1772_v49, %v256_v50  ;;  %v530_v50 = vld [vmem:[%s2718_s3 + $0x50] sm:$0xff] }
  0xa9   :  { %1427 = vmatmul.msk.f32.gmra.mxu1 %vm141_vm0, %v92_v1  ;;  %v103_v1 = vld [vmem:[%s2716_s0 + $0x190] sm:$0xff]  ;;  %s1522_s0 = smov 32  }
  0xaa   :  { %v464_v59 = vmax.f32 %v369_v56, 0.0  ;;  %v549_v56 = vld [vmem:[%s2718_s3 + $0xe8] sm:$0xff] }
  0xad   :  { %v1826_v4 = vpop.f32.mrf.mxu0 }
  0xae   :  { %v380_v5 = vpop.f32.mrf.mxu1  ;;  %v259_v60 = vadd.f32 %v1845_v10, %v1826_v4 }
  0xb0   :  { %305 = vmatmul.f32.gmra.mxu0 %v87_v6  ;;  %v372_v49 = vadd.f32 %v1784_v53, %v259_v60 }
  0xb1   :  { %1428 = vmatmul.msk.f32.gmra.mxu1 %vm141_vm0, %v94_v7 }
  0xb5   :  { %v261_v11 = vpop.f32.mrf.mxu0 }
  0xb6   :  { %v383_v12 = vpop.f32.mrf.mxu1  ;;  %v262_v15 = vadd.f32 %v1845_v10, %v261_v11 }
  0xb8   :  { %v1854_v16 = vadd.f32 %v374_v57, %v262_v15  ;;  %308 = vmatmul.f32.gmra.mxu0 %v89_v13 }
  0xb9   :  { %1429 = vmatmul.msk.f32.gmra.mxu1 %vm141_vm0, %v96_v14 }
  0xbd   :  { %v264_v19 = vpop.f32.mrf.mxu0 }
  0xbe   :  { %v386_v20 = vpop.f32.mrf.mxu1  ;;  %v265_v23 = vadd.f32 %v1845_v10, %v264_v19 }
  0xc0   :  { %v1871_v24 = vadd.f32 %v377_v63, %v265_v23  ;;  %311 = vmatmul.f32.gmra.mxu0 %v91_v21 }
  0xc1   :  { %1430 = vmatmul.msk.f32.gmra.mxu1 %vm141_vm0, %v98_v22 }
  0xc2   :  { %v467_v19 = vmax.f32 %v1871_v24, 0.0  ;;  %v535_v24 = vld [vmem:[%s2718_s3 + $0x78] sm:$0xff] }
  0xc3   :  { %652 = vmatpush.msrb.mxu2 %v535_v24  ;;  %v538_v24 = vld [vmem:[%s2718_s3 + $0x90] sm:$0xff] }
  0xc5   :  { %v267_v25 = vpop.f32.mrf.mxu0 }
  0xc6   :  { %v389_v26 = vpop.f32.mrf.mxu1  ;;  %v268_v29 = vadd.f32 %v1845_v10, %v267_v25 }
  0xc8   :  { %v1881_v30 = vadd.f32 %v380_v5, %v268_v29  ;;  %314 = vmatmul.f32.gmra.mxu0 %v93_v27  ;;  %v465_v5 = vmax.f32 %v372_v49, 0.0  ;;  %v2006_v49 = vpop.f32.mrf.mxu3 }
  0xc9   :  { %1431 = vmatmul.msk.f32.gmra.mxu1 %vm141_vm0, %v100_v28 }
  0xcd   :  { %v270_v31 = vpop.f32.mrf.mxu0 }
  0xce   :  { %v392_v32 = vpop.f32.mrf.mxu1  ;;  %v271_v35 = vadd.f32 %v1845_v10, %v270_v31 }
  0xd0   :  { %v1891_v36 = vadd.f32 %v383_v12, %v271_v35  ;;  %317 = vmatmul.f32.gmra.mxu0 %v95_v33  ;;  %v466_v12 = vmax.f32 %v1854_v16, 0.0  ;;  %v468_v16 = vmax.f32 %v1881_v30, 0.0  ;;  %v534_v30 = vld [vmem:[%s2718_s3 + $0x70] sm:$0xff] }
  0xd1   :  { %1432 = vmatmul.msk.f32.gmra.mxu1 %vm141_vm0, %v102_v34  ;;  %653 = vmatpush.msrb.mxu2 %v534_v30 }
  0xd2   :  { %v469_v34 = vmax.f32 %v1891_v36, 0.0  ;;  %v532_v36 = vld [vmem:[%s2718_s3 + $0x60] sm:$0xff] }
  0xd5   :  { %v273_v37 = vpop.f32.mrf.mxu0 }
  0xd6   :  { %v395_v38 = vpop.f32.mrf.mxu1  ;;  %v274_v41 = vadd.f32 %v1845_v10, %v273_v37 }
  0xd8   :  { %v1901_v42 = vadd.f32 %v386_v20, %v274_v41  ;;  %320 = vmatmul.f32.gmra.mxu0 %v97_v39 }
  0xd9   :  { %1433 = vmatmul.msk.f32.gmra.mxu1 %vm141_vm0, %v104_v40  ;;  %v533_v40 = vld [vmem:[%s2718_s3 + $0x68] sm:$0xff] }
  0xda   :  { %654 = vmatpush.msrb.mxu2 %v533_v40  ;;  %v564_v40 = vld [vmem:[%s2718_s3 + $0x160] sm:$0xff] }
  0xdc   :  { %655 = vmatpush.msrb.mxu2 %v532_v36  ;;  %v563_v36 = vld [vmem:[%s2718_s3 + $0x158] sm:$0xff] }
  0xdd   :  { %v276_v43 = vpop.f32.mrf.mxu0 }
  0xde   :  { %v398_v44 = vpop.f32.mrf.mxu1  ;;  %v277_v47 = vadd.f32 %v1845_v10, %v276_v43 }
  0xe0   :  { %v1911_v48 = vadd.f32 %v389_v26, %v277_v47  ;;  %323 = vmatmul.f32.gmra.mxu0 %v99_v45  ;;  %v551_v45 = vld [vmem:[%s2718_s3 + $0xf8] sm:$0xff] }
  0xe1   :  { %1434 = vmatmul.msk.f32.gmra.mxu1 %vm141_vm0, %v106_v46  ;;  %v470_v46 = vmax.f32 %v1901_v42, 0.0  ;;  %672 = vmatpush.msrb.mxu3 %v551_v45  ;;  %v529_v42 = vld [vmem:[%s2718_s3 + $0x48] sm:$0xff]  ;;  %v562_v45 = vld [vmem:[%s2718_s3 + $0x150] sm:$0xff] }
  0xe5   :  { %v279_v51 = vpop.f32.mrf.mxu0 }
  0xe6   :  { %v401_v52 = vpop.f32.mrf.mxu1  ;;  %v280_v57 = vadd.f32 %v1845_v10, %v279_v51  ;;  %v550_v51 = vld [vmem:[%s2718_s3 + $0xf0] sm:$0xff] }
  0xe7   :  { %673 = vmatpush.msrb.mxu3 %v550_v51 }
  0xe8   :  { %v393_v58 = vadd.f32 %v392_v32, %v280_v57  ;;  %326 = vmatmul.f32.gmra.mxu0 %v101_v54 }
  0xe9   :  { %1435 = vmatmul.msk.f32.gmra.mxu1 %vm141_vm0, %v108_v55  ;;  %674 = vmatpush.msrb.mxu3 %v549_v56  ;;  %v580_v56 = vld [vmem:[%s2718_s3 + $0x1e0] sm:$0xff] }
  0xea   :  { %v472_v61 = vmax.f32 %v393_v58, 0.0  ;;  %v528_v58 = vld [vmem:[%s2718_s3 + $0x40] sm:$0xff] }
  0xec   :  { %v1927_v62 = vmax.f32 %v464_v59, %v472_v61  ;;  %v548_v59 = vld [vmem:[%s2718_s3 + $0xe0] sm:$0xff]  ;;  %v527_v61 = vld [vmem:[%s2718_s3 + $0x38] sm:$0xff] }
  0xed   :  { %v282_v63 = vpop.f32.mrf.mxu0  ;;  %675 = vmatpush.msrb.mxu3 %v548_v59  ;;  %v559_v59 = vld [vmem:[%s2718_s3 + $0x138] sm:$0xff] }
  0xee   :  { %v404_v0 = vpop.f32.mrf.mxu1  ;;  %v283_v2 = vadd.f32 %v1845_v10, %v282_v63  ;;  %v547_v63 = vld [vmem:[%s2718_s3 + $0xd8] sm:$0xff] }
  0xef   :  { %676 = vmatpush.msrb.mxu3 %v547_v63  ;;  %v578_v63 = vld [vmem:[%s2718_s3 + $0x1d0] sm:$0xff] }
  0xf0   :  { %v396_v3 = vadd.f32 %v395_v38, %v283_v2  ;;  %329 = vmatmul.f32.gmra.mxu0 %v103_v1  ;;  %v526_v2 = vld [vmem:[%s2718_s3 + $0x30] sm:$0xff] }
  0xf2   :  { %v473_v6 = vmax.f32 %v396_v3, 0.0  ;;  %v546_v3 = vld [vmem:[%s2718_s3 + $0xd0] sm:$0xff] }
  0xf3   :  { %677 = vmatpush.msrb.mxu3 %v546_v3  ;;  %v577_v3 = vld [vmem:[%s2718_s3 + $0x1c8] sm:$0xff] }
  0xf4   :  { %v1934_v7 = vmax.f32 %v465_v5, %v473_v6 }
  0xf5   :  { %v285_v4 = vpop.f32.mrf.mxu0 }
  0xf6   :  { %v407_v8 = vpop.f32.mrf.mxu1  ;;  %v286_v9 = vadd.f32 %v1845_v10, %v285_v4 }
  0xf8   :  { %v399_v11 = vadd.f32 %v398_v44, %v286_v9  ;;  %v531_v44 = vld [vmem:[%s2718_s3 + $0x58] sm:$0xff] }
  0xf9   :  { %656 = vmatpush.msrb.mxu2 %v531_v44  ;;  %v452_v44 = vpop.f32.mrf.mxu2 }
  0xfa   :  { %v474_v13 = vmax.f32 %v399_v11, 0.0  ;;  %v524_v11 = vld [vmem:[%s2718_s3 + $0x20] sm:$0xff] }
  0xfb   :  { %657 = vmatpush.msrb.mxu2 %v530_v50  ;;  %v581_v50 = vld [vmem:[%s2718_s3 + $0x1e8] sm:$0xff] }
  0xfc   :  { %v1938_v14 = vmax.f32 %v466_v12, %v474_v13  ;;  %v544_v12 = vld [vmem:[%s2718_s3 + $0xc0] sm:$0xff] }
  0xfd   :  { %v288_v15 = vpop.f32.mrf.mxu0  ;;  %658 = vmatpush.msrb.mxu2 %v529_v42  ;;  %v560_v42 = vld [vmem:[%s2718_s3 + $0x140] sm:$0xff] }
  0xfe   :  { %v410_v53 = vpop.f32.mrf.mxu1  ;;  %v289_v17 = vadd.f32 %v1845_v10, %v288_v15  ;;  %v523_v15 = vld [vmem:[%s2718_s3 + $0x18] sm:$0xff] }
  0xff   :  { %659 = vmatpush.msrb.mxu2 %v528_v58 }
 0x100   :  { %v402_v18 = vadd.f32 %v401_v52, %v289_v17  ;;  %v522_v17 = vld [vmem:[%s2718_s3 + $0x10] sm:$0xff] }
 0x101   :  { %660 = vmatpush.msrb.mxu2 %v527_v61  ;;  %v558_v61 = vld [vmem:[%s2718_s3 + $0x130] sm:$0xff] }
 0x102   :  { %v475_v20 = vmax.f32 %v402_v18, 0.0  ;;  %v542_v18 = vld [vmem:[%s2718_s3 + $0xb0] sm:$0xff] }
 0x103   :  { %661 = vmatpush.msrb.mxu2 %v526_v2  ;;  %v557_v2 = vld [vmem:[%s2718_s3 + $0x128] sm:$0xff] }
 0x104   :  { %v1942_v21 = vmax.f32 %v467_v19, %v475_v20  ;;  %v2046_v19 = vpop.f32.mrf.mxu3 }
 0x105   :  { %v291_v22 = vpop.f32.mrf.mxu0 }
 0x106   :  { %v413_v23 = vpop.f32.mrf.mxu1  ;;  %v292_v25 = vadd.f32 %v1845_v10, %v291_v22 }
 0x108   :  { %v405_v26 = vadd.f32 %v404_v0, %v292_v25  ;;  %v471_v0 = vmax.f32 %v1911_v48, 0.0  ;;  %v525_v48 = vld [vmem:[%s2718_s3 + $0x28] sm:$0xff] }
 0x109   :  { %662 = vmatpush.msrb.mxu2 %v525_v48  ;;  %v541_v25 = vld [vmem:[%s2718_s3 + $0xa8] sm:$0xff] }
 0x10a   :  { %v476_v27 = vmax.f32 %v405_v26, 0.0 }
 0x10b   :  { %663 = vmatpush.msrb.mxu2 %v524_v11  ;;  %v576_v11 = vld [vmem:[%s2718_s3 + $0x1c0] sm:$0xff] }
 0x10c   :  { %v1946_v28 = vmax.f32 %v468_v16, %v476_v27  ;;  %v520_v16 = vld [vmem:[%s2718_s3] sm:$0xff] }
 0x10d   :  { %v294_v29 = vpop.f32.mrf.mxu0  ;;  %664 = vmatpush.msrb.mxu2 %v523_v15  ;;  %v540_v27 = vld [vmem:[%s2718_s3 + $0xa0] sm:$0xff] }
 0x10e   :  { %v1948_v31 = vpop.f32.mrf.mxu1  ;;  %v295_v32 = vadd.f32 %v1845_v10, %v294_v29 }
 0x10f   :  { %665 = vmatpush.msrb.mxu2 %v522_v17  ;;  %v555_v17 = vld [vmem:[%s2718_s3 + $0x118] sm:$0xff] }
 0x110   :  { %v408_v33 = vadd.f32 %v407_v8, %v295_v32  ;;  %v545_v8 = vld [vmem:[%s2718_s3 + $0xc8] sm:$0xff]  ;;  %v539_v32 = vld [vmem:[%s2718_s3 + $0x98] sm:$0xff] }
 0x111   :  { %678 = vmatpush.msrb.mxu3 %v545_v8 }
 0x112   :  { %v477_v35 = vmax.f32 %v408_v33, 0.0  ;;  %v566_v33 = vld [vmem:[%s2718_s3 + $0x170] sm:$0xff] }
 0x113   :  { %679 = vmatpush.msrb.mxu3 %v544_v12 }
 0x114   :  { %v1958_v37 = vmax.f32 %v469_v34, %v477_v35  ;;  %v565_v34 = vld [vmem:[%s2718_s3 + $0x168] sm:$0xff] }
 0x115   :  { %v297_v38 = vpop.f32.mrf.mxu0 }
 0x116   :  { %v1960_v39 = vpop.f32.mrf.mxu1  ;;  %v298_v41 = vadd.f32 %v1845_v10, %v297_v38  ;;  %v537_v38 = vld [vmem:[%s2718_s3 + $0x88] sm:$0xff] }
 0x118   :  { %v411_v43 = vadd.f32 %v410_v53, %v298_v41  ;;  %v543_v53 = vld [vmem:[%s2718_s3 + $0xb8] sm:$0xff]  ;;  %v536_v41 = vld [vmem:[%s2718_s3 + $0x80] sm:$0xff] }
 0x119   :  { %680 = vmatpush.msrb.mxu3 %v543_v53 }
 0x11a   :  { %v478_v47 = vmax.f32 %v411_v43, 0.0  ;;  %v583_v43 = vld [vmem:[%s2718_s3 + $0x1f8] sm:$0xff] }
 0x11b   :  { %681 = vmatpush.msrb.mxu3 %v542_v18  ;;  %v575_v18 = vld [vmem:[%s2718_s3 + $0x1b8] sm:$0xff] }
 0x11c   :  { %v1982_v52 = vmax.f32 %v470_v46, %v478_v47  ;;  %v582_v46 = vld [vmem:[%s2718_s3 + $0x1f0] sm:$0xff]  ;;  %v561_v47 = vld [vmem:[%s2718_s3 + $0x148] sm:$0xff] }
 0x11d   :  { %v300_v54 = vpop.f32.mrf.mxu0  ;;  %682 = vmatpush.msrb.mxu3 %v541_v25  ;;  %v554_v25 = vld [vmem:[%s2718_s3 + $0x110] sm:$0xff] }
 0x11e   :  { %v1984_v55 = vpop.f32.mrf.mxu1  ;;  %v301_v57 = vadd.f32 %v1845_v10, %v300_v54 }
 0x11f   :  { %683 = vmatpush.msrb.mxu3 %v540_v27  ;;  %v553_v27 = vld [vmem:[%s2718_s3 + $0x108] sm:$0xff] }
 0x120   :  { %v414_v60 = vadd.f32 %v413_v23, %v301_v57  ;;  %v521_v23 = vld [vmem:[%s2718_s3 + $0x8] sm:$0xff] }
 0x121   :  { %666 = vmatpush.msrb.mxu2 %v521_v23  ;;  %684 = vmatpush.msrb.mxu3 %v539_v32 }
 0x122   :  { %v479_v1 = vmax.f32 %v414_v60, 0.0  ;;  %v579_v60 = vld [vmem:[%s2718_s3 + $0x1d8] sm:$0xff] }
 0x123   :  { %667 = vmatpush.msrb.mxu2 %v520_v16  ;;  %685 = vmatpush.msrb.mxu3 %v538_v24 }
 0x124   :  { %v2014_v5 = vmax.f32 %v471_v0, %v479_v1  ;;  %v455_v1 = vpop.f32.mrf.mxu2 }
 0x125   :  { %v303_v6 = vpop.f32.mrf.mxu0  ;;  %686 = vmatpush.msrb.mxu3 %v537_v38  ;;  %v552_v38 = vld [vmem:[%s2718_s3 + $0x100] sm:$0xff] }
 0x126   :  { %v2016_v4 = vpop.f32.mrf.mxu1  ;;  %v304_v9 = vadd.f32 %v1845_v10, %v303_v6 }
 0x127   :  { %687 = vmatpush.msrb.mxu3 %v536_v41 }
 0x128   :  { %v2032_v13 = vadd.f32 %v1948_v31, %v304_v9  ;;  %v567_v31 = vld [vmem:[%s2718_s3 + $0x178] sm:$0xff]  ;;  %v556_v9 = vld [vmem:[%s2718_s3 + $0x120] sm:$0xff] }
 0x129   :  { %692 = vmatpush.msra.mxu2 %v567_v31  ;;  %712 = vmatpush.msra.mxu3 %v583_v43  ;;  %v573_v31 = vld [vmem:[%s2718_s3 + $0x1a8] sm:$0xff] }
 0x12b   :  { %693 = vmatpush.msra.mxu2 %v566_v33  ;;  %713 = vmatpush.msra.mxu3 %v582_v46  ;;  %v570_v46 = vld [vmem:[%s2718_s3 + $0x190] sm:$0xff] }
 0x12d   :  { %v306_v20 = vpop.f32.mrf.mxu0  ;;  %694 = vmatpush.msra.mxu2 %v565_v34  ;;  %714 = vmatpush.msra.mxu3 %v581_v50 }
 0x12e   :  { %v2048_v22 = vpop.f32.mrf.mxu1  ;;  %v307_v26 = vadd.f32 %v1845_v10, %v306_v20 }
 0x12f   :  { %695 = vmatpush.msra.mxu2 %v564_v40  ;;  %715 = vmatpush.msra.mxu3 %v580_v56  ;;  %v458_v40 = vpop.f32.mrf.mxu2 }
 0x130   :  { %v2064_v29 = vadd.f32 %v1960_v39, %v307_v26  ;;  %v339_v39 = vpop.f32.mrf.mxu3 }
 0x131   :  { %696 = vmatpush.msra.mxu2 %v563_v36  ;;  %v340_v57 = vadd.f32 %v1845_v10, %v339_v39  ;;  %716 = vmatpush.msra.mxu3 %v579_v60  ;;  %v572_v39 = vld [vmem:[%s2718_s3 + $0x1a0] sm:$0xff] }
 0x133   :  { %697 = vmatpush.msra.mxu2 %v562_v45  ;;  %717 = vmatpush.msra.mxu3 %v578_v63  ;;  %v453_v0 = vadd.f32 %v452_v44, %v340_v57  ;;  %v571_v44 = vld [vmem:[%s2718_s3 + $0x198] sm:$0xff]  ;;  %v569_v57 = vld [vmem:[%s2718_s3 + $0x188] sm:$0xff] }
 0x135   :  { %v2081_v35 = vpop.f32.mrf.mxu0  ;;  %698 = vmatpush.msra.mxu2 %v561_v47  ;;  %718 = vmatpush.msra.mxu3 %v577_v3  ;;  %v492_v15 = vmax.f32 %v453_v0, 0.0  ;;  %v334_v3 = vadd.f32 %v1845_v10, %v2006_v49 }
 0x136   :  { %v2083_v30 = vpop.f32.mrf.mxu1  ;;  %v310_v60 = vadd.f32 %v1845_v10, %v2081_v35 }
 0x137   :  { %699 = vmatpush.msra.mxu2 %v560_v42  ;;  %719 = vmatpush.msra.mxu3 %v576_v11 }
 0x138   :  { %v342_v58 = vpop.f32.mrf.mxu3 }
 0x139   :  { %700 = vmatpush.msra.mxu2 %v559_v59  ;;  %v343_v53 = vadd.f32 %v1845_v10, %v342_v58  ;;  %720 = vmatpush.msra.mxu3 %v575_v18 }
 0x13b   :  { %701 = vmatpush.msra.mxu2 %v558_v61  ;;  %v456_v16 = vadd.f32 %v455_v1, %v343_v53  ;;  %v568_v61 = vld [vmem:[%s2718_s3 + $0x180] sm:$0xff] }
 0x13d   :  { %v2112_v51 = vpop.f32.mrf.mxu0  ;;  %702 = vmatpush.msra.mxu2 %v557_v2  ;;  %v493_v36 = vmax.f32 %v456_v16, 0.0  ;;  %v461_v2 = vpop.f32.mrf.mxu2 }
 0x13e   :  { %v2114_v54 = vpop.f32.mrf.mxu1  ;;  %v313_v18 = vadd.f32 %v1845_v10, %v2112_v51 }
 0x13f   :  { %703 = vmatpush.msra.mxu2 %v556_v9 }
 0x140   :  { %v345_v23 = vpop.f32.mrf.mxu3  ;;  %v426_v16 = vadd.f32 %v2016_v4, %v313_v18  ;;  %v606_v18 = vld [vmem:[%s2718_s3 + $0x2b0] sm:$0xff] }
 0x141   :  { %704 = vmatpush.msra.mxu2 %v555_v17  ;;  %v346_v43 = vadd.f32 %v1845_v10, %v345_v23 }
 0x143   :  { %705 = vmatpush.msra.mxu2 %v554_v25  ;;  %v459_v50 = vadd.f32 %v458_v40, %v346_v43 }
 0x145   :  { %v315_v6 = vpop.f32.mrf.mxu0  ;;  %706 = vmatpush.msra.mxu2 %v553_v27  ;;  %v494_v0 = vmax.f32 %v459_v50, 0.0  ;;  %v599_v50 = vld [vmem:[%s2718_s3 + $0x278] sm:$0xff] }
 0x146   :  { %v2141_v48 = vpop.f32.mrf.mxu1  ;;  %v316_v8 = vadd.f32 %v1845_v10, %v315_v6 }
 0x147   :  { %707 = vmatpush.msra.mxu2 %v552_v38 }
 0x148   :  { %v429_v12 = vadd.f32 %v2048_v22, %v316_v8  ;;  %v574_v22 = vld [vmem:[%s2718_s3 + $0x1b0] sm:$0xff]  ;;  %v348_v42 = vpop.f32.mrf.mxu3  ;;  %v423_v8 = vadd.f32 %v1984_v55, %v310_v60  ;;  %v337_v55 = vadd.f32 %v1845_v10, %v2046_v19  ;;  %v480_v19 = vmax.f32 %v2032_v13, 0.0 }
 0x149   :  { %721 = vmatpush.msra.mxu3 %v574_v22  ;;  %v349_v1 = vadd.f32 %v1845_v10, %v348_v42  ;;  %v598_v13 = vld [vmem:[%s2718_s3 + $0x270] sm:$0xff] }
 0x14a   :  { %v484_v20 = vmax.f32 %v429_v12, 0.0  ;;  %v482_v17 = vmax.f32 %v423_v8, 0.0  ;;  %v614_v60 = vld [vmem:[%s2718_s3 + $0x2f0] sm:$0xff]  ;;  %v589_v8 = vld [vmem:[%s2718_s3 + $0x228] sm:$0xff] }
 0x14b   :  { %722 = vmatpush.msra.mxu3 %v573_v31  ;;  %v462_v35 = vadd.f32 %v461_v2, %v349_v1  ;;  %v591_v1 = vld [vmem:[%s2718_s3 + $0x238] sm:$0xff] }
 0x14c   :  { %v2164_v26 = vmax.f32 %v484_v20, %v492_v15  ;;  %v611_v2 = vld [vmem:[%s2718_s3 + $0x2d8] sm:$0xff] }
 0x14d   :  { %v318_v32 = vpop.f32.mrf.mxu0  ;;  %723 = vmatpush.msra.mxu3 %v572_v39  ;;  %v495_v23 = vmax.f32 %v462_v35, 0.0  ;;  %v483_v39 = vmax.f32 %v426_v16, 0.0  ;;  %v609_v35 = vld [vmem:[%s2718_s3 + $0x2c8] sm:$0xff]  ;;  %v630_v16 = vld [vmem:[%s2718_s3 + $0x370] sm:$0xff] }
 0x14e   :  { %v440_v33 = vpop.f32.mrf.mxu1  ;;  %v516_v24 = vmax.f32 %v1946_v28, %v2164_v26  ;;  %v319_v34 = vadd.f32 %v1845_v10, %v318_v32  ;;  %v628_v28 = vld [vmem:[%s2718_s3 + $0x360] sm:$0xff] }
 0x14f   :  { %724 = vmatpush.msra.mxu3 %v571_v44  ;;  %v600_v26 = vld [vmem:[%s2718_s3 + $0x280] sm:$0xff] }
 0x150   :  { %v432_v41 = vadd.f32 %v2083_v30, %v319_v34 }
 0x151   :  { %725 = vmatpush.msra.mxu3 %v570_v46 }
 0x152   :  { %v485_v45 = vmax.f32 %v432_v41, 0.0 }
 0x153   :  { %726 = vmatpush.msra.mxu3 %v569_v57  ;;  %v595_v57 = vld [vmem:[%s2718_s3 + $0x258] sm:$0xff] }
 0x154   :  { %v2189_v47 = vmax.f32 %v485_v45, %v493_v36 }
 0x155   :  { %v321_v56 = vpop.f32.mrf.mxu0  ;;  %727 = vmatpush.msra.mxu3 %v568_v61  ;;  %v613_v61 = vld [vmem:[%s2718_s3 + $0x2e8] sm:$0xff] }
 0x156   :  { %v443_v30 = vpop.f32.mrf.mxu1  ;;  %v517_v58 = vmax.f32 %v1958_v37, %v2189_v47  ;;  %v322_v59 = vadd.f32 %v1845_v10, %v321_v56  ;;  %v624_v37 = vld [vmem:[%s2718_s3 + $0x340] sm:$0xff] }
 0x157   :  { %v644_v47 = vld [vmem:[%s2718_s3 + $0x3e0] sm:$0xff] }
 0x158   :  { %v435_v63 = vadd.f32 %v2114_v54, %v322_v59  ;;  %v594_v59 = vld [vmem:[%s2718_s3 + $0x250] sm:$0xff] }
 0x15a   :  { %v486_v6 = vmax.f32 %v435_v63, 0.0  ;;  %v592_v63 = vld [vmem:[%s2718_s3 + $0x240] sm:$0xff] }
 0x15c   :  { %v2207_v9 = vmax.f32 %v486_v6, %v494_v0  ;;  %v612_v0 = vld [vmem:[%s2718_s3 + $0x2e0] sm:$0xff]  ;;  %v610_v6 = vld [vmem:[%s2718_s3 + $0x2d0] sm:$0xff] }
 0x15d   :  { %v324_v11 = vpop.f32.mrf.mxu0 }
 0x15e   :  { %v446_v12 = vpop.f32.mrf.mxu1  ;;  %v518_v15 = vmax.f32 %v1982_v52, %v2207_v9  ;;  %v325_v54 = vadd.f32 %v1845_v10, %v324_v11  ;;  %v588_v11 = vld [vmem:[%s2718_s3 + $0x220] sm:$0xff]  ;;  %v815_v52 = vld [vmem:[%s2721_s5 + $0x18] sm:$0xff]  ;;  %v814_v9 = vld [vmem:[%s2721_s5 + $0x10] sm:$0xff] }
 0x15f   :  { %v447_v53 = vadd.f32 %v446_v12, %v334_v3  ;;  %v590_v3 = vld [vmem:[%s2718_s3 + $0x230] sm:$0xff]  ;;  %v608_v12 = vld [vmem:[%s2718_s3 + $0x2c0] sm:$0xff] }
 0x160   :  { %v438_v49 = vadd.f32 %v2141_v48, %v325_v54  ;;  %v587_v54 = vld [vmem:[%s2718_s3 + $0x218] sm:$0xff] }
 0x161   :  { %v490_v20 = vmax.f32 %v447_v53, 0.0  ;;  %v607_v53 = vld [vmem:[%s2718_s3 + $0x2b8] sm:$0xff] }
 0x162   :  { %v487_v25 = vmax.f32 %v438_v49, 0.0  ;;  %v585_v49 = vld [vmem:[%s2718_s3 + $0x208] sm:$0xff] }
 0x163   :  { %v506_v22 = vmax.f32 %v482_v17, %v490_v20  ;;  %v586_v17 = vld [vmem:[%s2718_s3 + $0x210] sm:$0xff]  ;;  %v605_v20 = vld [vmem:[%s2718_s3 + $0x2a8] sm:$0xff] }
 0x164   :  { %v2219_v31 = vmax.f32 %v487_v25, %v495_v23  ;;  %v584_v23 = vld [vmem:[%s2718_s3 + $0x200] sm:$0xff]  ;;  %v631_v25 = vld [vmem:[%s2718_s3 + $0x378] sm:$0xff] }
 0x165   :  { %v514_v27 = vmax.f32 %v1938_v14, %v506_v22  ;;  %v327_v32 = vpop.f32.mrf.mxu0  ;;  %v603_v22 = vld [vmem:[%s2718_s3 + $0x298] sm:$0xff] }
 0x166   :  { %v449_v34 = vpop.f32.mrf.mxu1  ;;  %v519_v51 = vmax.f32 %v2014_v5, %v2219_v31  ;;  %v328_v48 = vadd.f32 %v1845_v10, %v327_v32  ;;  %v629_v32 = vld [vmem:[%s2718_s3 + $0x368] sm:$0xff]  ;;  %v2449_v5 = vld [vmem:[%s2722_s6 + $0x10] sm:$0xff] }
 0x167   :  { %v450_v38 = vadd.f32 %v449_v34, %v337_v55  ;;  %v604_v55 = vld [vmem:[%s2718_s3 + $0x2a0] sm:$0xff]  ;;  %v601_v34 = vld [vmem:[%s2718_s3 + $0x288] sm:$0xff] }
 0x168   :  { %v441_v40 = vadd.f32 %v440_v33, %v328_v48  ;;  %v481_v33 = vmax.f32 %v2064_v29, 0.0  ;;  %v615_v29 = vld [vmem:[%s2718_s3 + $0x2f8] sm:$0xff]  ;;  %v813_v31 = vld [vmem:[%s2721_s5 + $0x8] sm:$0xff] }
 0x169   :  { %v491_v41 = vmax.f32 %v450_v38, 0.0  ;;  %v647_v48 = vld [vmem:[%s2718_s3 + $0x3f8] sm:$0xff]  ;;  %v626_v38 = vld [vmem:[%s2718_s3 + $0x350] sm:$0xff] }
 0x16a   :  { %v488_v36 = vmax.f32 %v441_v40, 0.0  ;;  %v625_v40 = vld [vmem:[%s2718_s3 + $0x348] sm:$0xff] }
 0x16b   :  { %v507_v43 = vmax.f32 %v483_v39, %v491_v41  ;;  %v646_v39 = vld [vmem:[%s2718_s3 + $0x3f0] sm:$0xff]  ;;  %v645_v41 = vld [vmem:[%s2718_s3 + $0x3e8] sm:$0xff] }
 0x16c   :  { %v504_v4 = vmax.f32 %v480_v19, %v488_v36  ;;  %v643_v19 = vld [vmem:[%s2718_s3 + $0x3d8] sm:$0xff]  ;;  %v622_v36 = vld [vmem:[%s2718_s3 + $0x330] sm:$0xff] }
 0x16d   :  { %v515_v14 = vmax.f32 %v1942_v21, %v507_v43  ;;  %v330_v44 = vpop.f32.mrf.mxu0  ;;  %v596_v21 = vld [vmem:[%s2718_s3 + $0x260] sm:$0xff]  ;;  %v642_v43 = vld [vmem:[%s2718_s3 + $0x3d0] sm:$0xff] }
 0x16e   :  { %v331_v45 = vadd.f32 %v1845_v10, %v330_v44  ;;  %v512_v46 = vmax.f32 %v1927_v62, %v504_v4  ;;  %v597_v10 = vld [vmem:[%s2718_s3 + $0x268] sm:$0xff]  ;;  %v620_v44 = vld [vmem:[%s2718_s3 + $0x320] sm:$0xff] }
 0x16f   :  { %v621_v4 = vld [vmem:[%s2718_s3 + $0x328] sm:$0xff] }
 0x170   :  { %v444_v42 = vadd.f32 %v443_v30, %v331_v45  ;;  %668 = vmatmul.f32.vlgmr.msrb.gmra.mxu2 %v512_v46  ;;  %v640_v45 = vld [vmem:[%s2718_s3 + $0x3c0] sm:$0xff]  ;;  %v619_v46 = vld [vmem:[%s2718_s3 + $0x318] sm:$0xff] }
 0x171   :  { %732 = vmatpush.msrb.mxu2 %v599_v50  ;;  %v639_v50 = vld [vmem:[%s2718_s3 + $0x3b8] sm:$0xff] }
 0x172   :  { %v489_v56 = vmax.f32 %v444_v42, 0.0  ;;  %v618_v42 = vld [vmem:[%s2718_s3 + $0x310] sm:$0xff] }
 0x173   :  { %733 = vmatpush.msrb.mxu2 %v598_v13  ;;  %v638_v13 = vld [vmem:[%s2718_s3 + $0x3b0] sm:$0xff] }
 0x174   :  { %v505_v62 = vmax.f32 %v481_v33, %v489_v56  ;;  %v617_v33 = vld [vmem:[%s2718_s3 + $0x308] sm:$0xff] }
 0x175   :  { %734 = vmatpush.msrb.mxu2 %v597_v10  ;;  %v637_v56 = vld [vmem:[%s2718_s3 + $0x3a8] sm:$0xff]  ;;  %v616_v10 = vld [vmem:[%s2718_s3 + $0x300] sm:$0xff] }
 0x176   :  { %v513_v30 = vmax.f32 %v1934_v7, %v505_v62  ;;  %v593_v7 = vld [vmem:[%s2718_s3 + $0x248] sm:$0xff]  ;;  %v636_v62 = vld [vmem:[%s2718_s3 + $0x3a0] sm:$0xff] }
 0x177   :  { %735 = vmatpush.msrb.mxu2 %v596_v21  ;;  %v635_v21 = vld [vmem:[%s2718_s3 + $0x398] sm:$0xff] }
 0x178   :  { %688 = vmatmul.f32.vlgmr.msrb.gmra.mxu3 %v513_v30  ;;  %708 = vmatmul.f32.vlgmr.msra.gmra.mxu2 %v514_v27  ;;  %v602_v27 = vld [vmem:[%s2718_s3 + $0x290] sm:$0xff] }
 0x179   :  { %736 = vmatpush.msrb.mxu2 %v595_v57  ;;  %752 = vmatpush.msrb.mxu3 %v615_v29  ;;  %v634_v30 = vld [vmem:[%s2718_s3 + $0x390] sm:$0xff]  ;;  %v633_v57 = vld [vmem:[%s2718_s3 + $0x388] sm:$0xff]  ;;  %v632_v29 = vld [vmem:[%s2718_s3 + $0x380] sm:$0xff] }
 0x17b   :  { %737 = vmatpush.msrb.mxu2 %v594_v59  ;;  %753 = vmatpush.msrb.mxu3 %v614_v60  ;;  %v2461_v59 = vld [vmem:[%s2722_s6 + $0x8] sm:$0xff] }
 0x17d   :  { %738 = vmatpush.msrb.mxu2 %v593_v7  ;;  %754 = vmatpush.msrb.mxu3 %v613_v61  ;;  %v2467_v7 = vld [vmem:[%s2722_s6] sm:$0xff]  ;;  %v1519_v61 = vmov 0.0  }
 0x17f   :  { %739 = vmatpush.msrb.mxu2 %v592_v63  ;;  %755 = vmatpush.msrb.mxu3 %v612_v0 }
 0x180   :  { %728 = vmatmul.f32.vlgmr.msra.gmra.mxu3 %v515_v14  ;;  %v641_v14 = vld [vmem:[%s2718_s3 + $0x3c8] sm:$0xff] }
 0x181   :  { %740 = vmatpush.msrb.mxu2 %v591_v1  ;;  %756 = vmatpush.msrb.mxu3 %v611_v2  ;;  %v1476_v1 = vld [vmem:[%s2719_s4] ss:$0 sm:$0xff] }
 0x183   :  { %741 = vmatpush.msrb.mxu2 %v590_v3  ;;  %757 = vmatpush.msrb.mxu3 %v610_v6 }
 0x185   :  { %742 = vmatpush.msrb.mxu2 %v589_v8  ;;  %758 = vmatpush.msrb.mxu3 %v609_v35 }
 0x187   :  { %743 = vmatpush.msrb.mxu2 %v588_v11  ;;  %759 = vmatpush.msrb.mxu3 %v608_v12 }
 0x189   :  { %744 = vmatpush.msrb.mxu2 %v587_v54  ;;  %760 = vmatpush.msrb.mxu3 %v607_v53 }
 0x18b   :  { %745 = vmatpush.msrb.mxu2 %v586_v17  ;;  %761 = vmatpush.msrb.mxu3 %v606_v18 }
 0x18d   :  { %746 = vmatpush.msrb.mxu2 %v585_v49  ;;  %762 = vmatpush.msrb.mxu3 %v605_v20 }
 0x18f   :  { %747 = vmatpush.msrb.mxu2 %v584_v23  ;;  %763 = vmatpush.msrb.mxu3 %v604_v55  ;;  %v856_v23 = vlaneseq }
 0x190   :  { %748 = vmatmul.f32.vlgmr.msrb.gmra.mxu2 %v516_v24  ;;  %v627_v24 = vld [vmem:[%s2718_s3 + $0x358] sm:$0xff] }
 0x191   :  { %772 = vmatpush.msra.mxu2 %v631_v25  ;;  %764 = vmatpush.msrb.mxu3 %v603_v22  ;;  %v857_v55 = vand.u32 127, %v856_v23  ;;  %v1477_v25 = vld [vmem:[%s2720_s7] ss:$0 sm:$0xff]  ;;  %s1521_s7 = smov 64  }
 0x193   :  { %773 = vmatpush.msra.mxu2 %v630_v16  ;;  %765 = vmatpush.msrb.mxu3 %v602_v27  ;;  %vm858_vm1 = vcmp.ge.s32.totalorder %v857_v55, 64  ;;  %vm859_vm2 = vcmp.lt.s32.totalorder %v857_v55, 96 }
 0x194   :  { %vm860_vm3 = vmand %vm858_vm1, %vm859_vm2 }
 0x195   :  { %774 = vmatpush.msra.mxu2 %v629_v32  ;;  %766 = vmatpush.msrb.mxu3 %v601_v34  ;;  %v1520_v32 = vmov 0.5  }
 0x196   :  { %v2483_v34 = vsel %vm860_vm3, 1.0, %v1520_v32 }
 0x197   :  { %775 = vmatpush.msra.mxu2 %v628_v28  ;;  %767 = vmatpush.msrb.mxu3 %v600_v26 }
 0x198   :  { %768 = vmatmul.f32.vlgmr.msrb.gmra.mxu3 %v517_v58  ;;  %v623_v58 = vld [vmem:[%s2718_s3 + $0x338] sm:$0xff] }
 0x199   :  { %776 = vmatpush.msra.mxu2 %v627_v24  ;;  %792 = vmatpush.msra.mxu3 %v647_v48  ;;  %v2487_v48 = vsel %vm860_vm3, 0.0, %v1520_v32 }
 0x19b   :  { %777 = vmatpush.msra.mxu2 %v626_v38  ;;  %793 = vmatpush.msra.mxu3 %v646_v39 }
 0x19d   :  { %778 = vmatpush.msra.mxu2 %v625_v40  ;;  %794 = vmatpush.msra.mxu3 %v645_v41 }
 0x19f   :  { %779 = vmatpush.msra.mxu2 %v624_v37  ;;  %795 = vmatpush.msra.mxu3 %v644_v47 }
 0x1a1   :  { %780 = vmatpush.msra.mxu2 %v623_v58  ;;  %796 = vmatpush.msra.mxu3 %v643_v19 }
 0x1a3   :  { %781 = vmatpush.msra.mxu2 %v622_v36  ;;  %797 = vmatpush.msra.mxu3 %v642_v43  ;;  %v2500_v36 = vld [vmem:[%s2723_s8 + $0x38] sm:$0xff]  ;;  %v2505_v43 = vld [vmem:[%s2723_s8 + $0x30] sm:$0xff] }
 0x1a5   :  { %782 = vmatpush.msra.mxu2 %v621_v4  ;;  %798 = vmatpush.msra.mxu3 %v641_v14  ;;  %v2512_v4 = vld [vmem:[%s2723_s8 + $0x28] sm:$0xff]  ;;  %v2519_v14 = vld [vmem:[%s2723_s8 + $0x20] sm:$0xff] }
 0x1a7   :  { %783 = vmatpush.msra.mxu2 %v620_v44  ;;  %799 = vmatpush.msra.mxu3 %v640_v45  ;;  %v2526_v44 = vld [vmem:[%s2723_s8 + $0x18] sm:$0xff]  ;;  %v2533_v45 = vld [vmem:[%s2723_s8 + $0x10] sm:$0xff] }
 0x1a9   :  { %784 = vmatpush.msra.mxu2 %v619_v46  ;;  %800 = vmatpush.msra.mxu3 %v639_v50  ;;  %v2540_v46 = vld [vmem:[%s2723_s8 + $0x8] sm:$0xff] }
 0x1ab   :  { %785 = vmatpush.msra.mxu2 %v618_v42  ;;  %801 = vmatpush.msra.mxu3 %v638_v13  ;;  %v2550_v13 = vld [vmem:[%s2723_s8] sm:$0xff] }
 0x1ad   :  { %786 = vmatpush.msra.mxu2 %v617_v33  ;;  %802 = vmatpush.msra.mxu3 %v637_v56 }
 0x1af   :  { %787 = vmatpush.msra.mxu2 %v616_v10  ;;  %803 = vmatpush.msra.mxu3 %v636_v62  ;;  %v2576_v10 = vld [vmem:[%s2724_s9] ss:$0 sm:$0xff] }
 0x1b0   :  { %788 = vmatmul.f32.vlgmr.msra.gmra.mxu2 %v518_v15  ;;  %v2443_v15 = vld [vmem:[%s2722_s6 + $0x18] sm:$0xff] }
 0x1b1   :  { %804 = vmatpush.msra.mxu3 %v635_v21  ;;  %835 = vmatpush.msrb.mxu2 %v815_v52 }
 0x1b3   :  { %805 = vmatpush.msra.mxu3 %v634_v30  ;;  %836 = vmatpush.msrb.mxu2 %v814_v9 }
 0x1b5   :  { %806 = vmatpush.msra.mxu3 %v633_v57  ;;  %837 = vmatpush.msrb.mxu2 %v813_v31 }
 0x1b7   :  { %807 = vmatpush.msra.mxu3 %v632_v29 }
 0x1b8   :  { %808 = vmatmul.f32.vlgmr.msra.gmra.mxu3 %v519_v51  ;;  %v812_v51 = vld [vmem:[%s2721_s5] sm:$0xff] }
 0x1b9   :  { %878 = vmatpush.msrb.mxu3 %v2443_v15  ;;  %838 = vmatpush.msrb.mxu2 %v812_v51 }
 0x1bb   :  { %879 = vmatpush.msrb.mxu3 %v2449_v5  ;;  %928 = vmatpush.msra.mxu2 %v2500_v36 }
 0x1bd   :  { %880 = vmatpush.msrb.mxu3 %v2461_v59  ;;  %929 = vmatpush.msra.mxu2 %v2505_v43 }
 0x1bf   :  { %881 = vmatpush.msrb.mxu3 %v2467_v7  ;;  %930 = vmatpush.msra.mxu2 %v2512_v4 }
 0x1c0   :  { %882 = vmatmul.f32.vlgmr.msrb.gmra.mxu3 %v1519_v61 }
 0x1c1   :  { %981 = vmatpush.msra.mxu3 %v2443_v15  ;;  %931 = vmatpush.msra.mxu2 %v2519_v14 }
 0x1c3   :  { %982 = vmatpush.msra.mxu3 %v2449_v5  ;;  %932 = vmatpush.msra.mxu2 %v2526_v44 }
 0x1c5   :  { %983 = vmatpush.msra.mxu3 %v2461_v59  ;;  %933 = vmatpush.msra.mxu2 %v2533_v45 }
 0x1c7   :  { %984 = vmatpush.msra.mxu3 %v2467_v7  ;;  %934 = vmatpush.msra.mxu2 %v2540_v46 }
 0x1c9   :  { %1038 = vmatpush.msrb.mxu3 %v2500_v36  ;;  %935 = vmatpush.msra.mxu2 %v2550_v13 }
 0x1cb   :  { %1039 = vmatpush.msrb.mxu3 %v2505_v43 }
 0x1cd   :  { %1040 = vmatpush.msrb.mxu3 %v2512_v4 }
 0x1cf   :  { %1041 = vmatpush.msrb.mxu3 %v2519_v14 }
 0x1d1   :  { %1042 = vmatpush.msrb.mxu3 %v2526_v44 }
 0x1d3   :  { %1043 = vmatpush.msrb.mxu3 %v2533_v45 }
 0x1d5   :  { %1044 = vmatpush.msrb.mxu3 %v2540_v46 }
 0x1d7   :  { %1045 = vmatpush.msrb.mxu3 %v2550_v13 }
 0x1f3   :  { %v669_v60 = vpop.f32.mrf.mxu2 }
 0x1f4   :  { %v670_v3 = vadd.f32 %v1476_v1, %v669_v60 }
 0x1fb   :  { %v689_v63 = vpop.f32.mrf.mxu3  ;;  %v709_v0 = vpop.f32.mrf.mxu2 }
 0x1fc   :  { %v690_v6 = vadd.f32 %v689_v63, %v670_v3 }
 0x1fe   :  { %v710_v35 = vadd.f32 %v709_v0, %v690_v6 }
 0x203   :  { %v729_v2 = vpop.f32.mrf.mxu3 }
 0x204   :  { %v730_v12 = vadd.f32 %v729_v2, %v710_v35 }
 0x213   :  { %v749_v8 = vpop.f32.mrf.mxu2 }
 0x214   :  { %v750_v54 = vadd.f32 %v749_v8, %v730_v12 }
 0x21b   :  { %v769_v11 = vpop.f32.mrf.mxu3 }
 0x21c   :  { %v770_v17 = vadd.f32 %v769_v11, %v750_v54 }
 0x233   :  { %v789_v53 = vpop.f32.mrf.mxu2 }
 0x234   :  { %v790_v18 = vadd.f32 %v789_v53, %v770_v17 }
 0x23b   :  { %v809_v49 = vpop.f32.mrf.mxu3 }
 0x23c   :  { %v810_v20 = vadd.f32 %v809_v49, %v790_v18 }
 0x23e   :  { %1440 = vmatmul.msk.f32.vlgmr.msrb.gmra.mxu2 %vm141_vm0, %v810_v20 }
 0x23f   :  { %1093 = vmatpush.msrb.mxu2 %v2443_v15 }
 0x241   :  { %1094 = vmatpush.msrb.mxu2 %v2449_v5 }
 0x243   :  { %v883_v16 = vpop.f32.mrf.mxu3  ;;  %1095 = vmatpush.msrb.mxu2 %v2461_v59 }
 0x245   :  { %1096 = vmatpush.msrb.mxu2 %v2467_v7 }
 0x2c1   :  { %v840_v22 = vpop.f32.mrf.mxu2 }
 0x2c2   :  { %v2481_v27 = vadd.f32 %v1477_v25, %v840_v22 }
 0x2c4   :  { %v886_v28 = vadd.f32 %v883_v16, %v2481_v27 }
 0x2c6   :  { %v887_v26 = vmul.f32 %v886_v28, %v2483_v34 }
 0x2c8   :  { %1483 = vtanh.f32 %v887_v26 }
 0x2ce   :  { %v1484_v24 = vpop.eup %1483 }
 0x2cf   :  { %v889_v38 = vmul.f32 %v1484_v24, %v2483_v34 }
 0x2d1   :  { %v890_v39 = vadd.f32 %v889_v38, %v2487_v48 }
 0x2d3   :  { %893 = vrot.lane.b32.xlu0 %v890_v39, %s1521_s7  ;;  %v891_v37 = vmul.f32 0.0, %v890_v39 }
 0x345   :  { %v894_v40 = vpop.permute.xlu0 %893 }
 0x346   :  { %v896_v41 = vmul.f32 %v894_v40, %v890_v39 }
 0x348   :  { %898 = vrot.lane.b32.xlu0 %v896_v41, %s1522_s0 }
 0x3ba   :  { %v899_v47 = vpop.permute.xlu0 %898 }
 0x3bb   :  { %v2493_v58 = vadd.f32 %v899_v47, %v891_v37 }
 0x3bd   :  { %1485 = vtanh.f32 %v2493_v58  ;;  %v998_v6 = vrot.slane %v2493_v58, 6 }
 0x3c3   :  { %v1486_v19 = vpop.eup %1485 }
 0x3c4   :  { %904 = vrot.lane.b32.xlu1 %v1486_v19, %s1521_s7 }
 0x436   :  { %v905_v50 = vpop.permute.xlu1 %904 }
 0x437   :  { %v907_v42 = vmul.f32 %v905_v50, %v890_v39 }
 0x439   :  { %909 = vrot.lane.b32.xlu1 %v907_v42, %s1522_s0 }
 0x4ab   :  { %v910_v33 = vpop.permute.xlu1 %909 }
 0x4ac   :  { %v912_v56 = vsel %vm141_vm0, %v910_v33, 0.0  ;;  %1442 = vmatmul.msk.f32.vlgmr.msra.gmra.mxu3 %vm141_vm0, %v910_v33 }
 0x4ad   :  { %1441 = vmatmul.msk.f32.vlgmr.msra.gmra.mxu2 %vm916_vm4, %v912_v56  ;;  %1205 = vmatpush.msra.mxu3 %v2443_v15 }
 0x4ae   :  { %1150 = vmatpush.msra.mxu2 %v2500_v36 }
 0x4af   :  { %1206 = vmatpush.msra.mxu3 %v2449_v5 }
 0x4b0   :  { %1151 = vmatpush.msra.mxu2 %v2505_v43 }
 0x4b1   :  { %1207 = vmatpush.msra.mxu3 %v2461_v59 }
 0x4b2   :  { %1152 = vmatpush.msra.mxu2 %v2512_v4 }
 0x4b3   :  { %1208 = vmatpush.msra.mxu3 %v2467_v7 }
 0x4b4   :  { %1153 = vmatpush.msra.mxu2 %v2519_v14 }
 0x4b6   :  { %1154 = vmatpush.msra.mxu2 %v2526_v44 }
 0x4b8   :  { %1155 = vmatpush.msra.mxu2 %v2533_v45 }
 0x4ba   :  { %1156 = vmatpush.msra.mxu2 %v2540_v46 }
 0x4bc   :  { %1157 = vmatpush.msra.mxu2 %v2550_v13 }
 0x52f   :  { %v986_v62 = vpop.f32.mrf.mxu3 }
 0x530   :  { %v990_v21 = vrot.slane %v986_v62, 6  ;;  %v937_v30 = vpop.f32.mrf.mxu2 }
 0x531   :  { %v938_v57 = vadd.f32 %v2576_v10, %v937_v30 }
 0x532   :  { %v992_v29 = vadd.f32 %v990_v21, %v2481_v27 }
 0x533   :  { %v940_v52 = vmul.f32 %v938_v57, %v2483_v34 }
 0x534   :  { %v993_v9 = vmul.f32 %v992_v29, %v2483_v34 }
 0x535   :  { %1487 = vtanh.f32 %v940_v52 }
 0x536   :  { %1489 = vtanh.f32 %v993_v9 }
 0x53b   :  { %v1488_v15 = vpop.eup %1487 }
 0x53c   :  { %v942_v5 = vmul.f32 %v1488_v15, %v2483_v34  ;;  %v1490_v51 = vpop.eup %1489 }
 0x53d   :  { %v995_v59 = vmul.f32 %v1490_v51, %v2483_v34 }
 0x53e   :  { %v943_v31 = vadd.f32 %v942_v5, %v2487_v48 }
 0x53f   :  { %v996_v60 = vadd.f32 %v995_v59, %v2487_v48 }
 0x540   :  { %946 = vrot.lane.b32.xlu2 %v943_v31, %s1521_s7  ;;  %v944_v1 = vmul.f32 0.0, %v943_v31 }
 0x541   :  { %v1000_v8 = vmul.f32 %v998_v6, %v996_v60 }
 0x548   :  { %1002 = vrot.lane.b32.xlu2 %v996_v60, %s1521_s7 }
 0x59a   :  { %v947_v7 = vpop.permute.xlu2 %946 }
 0x59b   :  { %v949_v61 = vmul.f32 %v947_v7, %v943_v31 }
 0x59d   :  { %951 = vrot.lane.b32.xlu0 %v949_v61, %s1522_s0 }
 0x5a2   :  { %v1003_v63 = vpop.permute.xlu2 %1002 }
 0x5a3   :  { %v1005_v0 = vmul.f32 %v1003_v63, %v996_v60 }
 0x5a5   :  { %1007 = vrot.lane.b32.xlu1 %v1005_v0, %s1522_s0 }
 0x60f   :  { %v952_v2 = vpop.permute.xlu0 %951 }
 0x610   :  { %v2590_v3 = vadd.f32 %v952_v2, %v944_v1 }
 0x612   :  { %1491 = vtanh.f32 %v2590_v3 }
 0x617   :  { %v1008_v35 = vpop.permute.xlu1 %1007 }
 0x618   :  { %v1492_v11 = vpop.eup %1491  ;;  %v1010_v12 = vadd.f32 %v1008_v35, %v1000_v8 }
 0x619   :  { %957 = vrot.lane.b32.xlu2 %v1492_v11, %s1521_s7 }
 0x61a   :  { %1493 = vtanh.f32 %v1010_v12 }
 0x620   :  { %v1494_v54 = vpop.eup %1493 }
 0x621   :  { %1013 = vrot.lane.b32.xlu0 %v1494_v54, %s1521_s7 }
 0x673   :  { %v958_v53 = vpop.permute.xlu2 %957 }
 0x674   :  { %v2596_v17 = vmul.f32 %v958_v53, %v943_v31 }
 0x676   :  { %v1021_v18 = vrot.slane %v2596_v17, 6 }
 0x678   :  { %1022 = vrot.lane.b32.xlu2 %v1021_v18, %s1521_s7 }
 0x693   :  { %v1014_v49 = vpop.permute.xlu0 %1013 }
 0x694   :  { %v1016_v20 = vmul.f32 %v1014_v49, %v996_v60 }
 0x696   :  { %v1076_v23 = vrot.slane %v1016_v20, 2  ;;  %1018 = vrot.lane.b32.xlu1 %v1016_v20, %s1522_s0 }
 0x698   :  { %1077 = vrot.lane.b32.xlu0 %v1076_v23, %s1522_s0 }
 0x6d2   :  { %v1023_v55 = vpop.permute.xlu2 %1022 }
 0x708   :  { %v1019_v25 = vpop.permute.xlu1 %1018 }
 0x709   :  { %v1025_v22 = vsel %vm141_vm0, %v1019_v25, %v1023_v55 }
 0x70a   :  { %v1027_v16 = vrot.slane %v1025_v22, 2  ;;  %v1078_v32 = vpop.permute.xlu0 %1077 }
 0x70b   :  { %1444 = vmatmul.msk.f32.vlgmr.msrb.gmra.mxu2 %vm141_vm0, %v1078_v32 }
 0x70c   :  { %1443 = vmatmul.msk.f32.vlgmr.msrb.gmra.mxu3 %vm916_vm4, %v1027_v16 }
 0x70d   :  { %1262 = vmatpush.msrb.mxu3 %v2500_v36 }
 0x70f   :  { %1263 = vmatpush.msrb.mxu3 %v2505_v43 }
 0x711   :  { %1264 = vmatpush.msrb.mxu3 %v2512_v4 }
 0x713   :  { %1265 = vmatpush.msrb.mxu3 %v2519_v14 }
 0x715   :  { %1266 = vmatpush.msrb.mxu3 %v2526_v44 }
 0x717   :  { %1267 = vmatpush.msrb.mxu3 %v2533_v45 }
 0x719   :  { %1268 = vmatpush.msrb.mxu3 %v2540_v46  ;;  %v1110_v46 = vrot.slane %v1010_v12, 6 }
 0x71b   :  { %1269 = vmatpush.msrb.mxu3 %v2550_v13 }
 0x78e   :  { %v1098_v28 = vpop.f32.mrf.mxu2 }
 0x78f   :  { %v1102_v26 = vrot.slane %v1098_v28, 4  ;;  %v1047_v24 = vpop.f32.mrf.mxu3 }
 0x790   :  { %v1048_v38 = vadd.f32 %v2576_v10, %v1047_v24 }
 0x791   :  { %v1104_v39 = vadd.f32 %v1102_v26, %v2481_v27 }
 0x792   :  { %v1050_v40 = vmul.f32 %v1048_v38, %v2483_v34 }
 0x793   :  { %v1105_v41 = vmul.f32 %v1104_v39, %v2483_v34 }
 0x794   :  { %1495 = vtanh.f32 %v1050_v40 }
 0x795   :  { %1497 = vtanh.f32 %v1105_v41 }
 0x79a   :  { %v1496_v37 = vpop.eup %1495 }
 0x79b   :  { %v1498_v47 = vpop.eup %1497  ;;  %v1052_v58 = vmul.f32 %v1496_v37, %v2483_v34 }
 0x79c   :  { %v1107_v19 = vmul.f32 %v1498_v47, %v2483_v34 }
 0x79d   :  { %v1053_v36 = vadd.f32 %v1052_v58, %v2487_v48 }
 0x79e   :  { %v1108_v43 = vadd.f32 %v1107_v19, %v2487_v48 }
 0x79f   :  { %1056 = vrot.lane.b32.xlu1 %v1053_v36, %s1521_s7  ;;  %v1054_v56 = vmul.f32 %v1053_v36, %v2590_v3 }
 0x7a0   :  { %1114 = vrot.lane.b32.xlu2 %v1108_v43, %s1521_s7  ;;  %v1112_v50 = vmul.f32 %v1110_v46, %v1108_v43 }
 0x7fa   :  { %v1115_v4 = vpop.permute.xlu2 %1114 }
 0x7fb   :  { %v1117_v14 = vmul.f32 %v1115_v4, %v1108_v43 }
 0x7fd   :  { %1119 = vrot.lane.b32.xlu1 %v1117_v14, %s1522_s0 }
 0x811   :  { %v1057_v44 = vpop.permute.xlu1 %1056 }
 0x812   :  { %v1059_v45 = vmul.f32 %v1057_v44, %v1053_v36 }
 0x814   :  { %1061 = vrot.lane.b32.xlu0 %v1059_v45, %s1522_s0 }
 0x86f   :  { %v1120_v42 = vpop.permute.xlu1 %1119 }
 0x870   :  { %v1122_v13 = vadd.f32 %v1120_v42, %v1112_v50 }
 0x872   :  { %1499 = vtanh.f32 %v1122_v13  ;;  %v1222_v23 = vrot.slane %v1122_v13, 6 }
 0x878   :  { %v1500_v33 = vpop.eup %1499 }
 0x879   :  { %1125 = vrot.lane.b32.xlu0 %v1500_v33, %s1521_s7 }
 0x886   :  { %v1062_v62 = vpop.permute.xlu0 %1061 }
 0x887   :  { %v1064_v21 = vadd.f32 %v1062_v62, %v1054_v56 }
 0x889   :  { %1501 = vtanh.f32 %v1064_v21 }
 0x88f   :  { %v1502_v30 = vpop.eup %1501 }
 0x890   :  { %1067 = vrot.lane.b32.xlu2 %v1502_v30, %s1521_s7 }
 0x8ea   :  { %v1068_v57 = vpop.permute.xlu2 %1067 }
 0x8eb   :  { %v2628_v29 = vmul.f32 %v1068_v57, %v1053_v36  ;;  %v1126_v52 = vpop.permute.xlu0 %1125 }
 0x8ec   :  { %v1128_v9 = vmul.f32 %v1126_v52, %v1108_v43  ;;  %v1523_v52 = vmov 32.0  }
 0x8ed   :  { %v1133_v15 = vrot.slane %v2628_v29, 4 }
 0x8ee   :  { %v1188_v5 = vrot.slane %v1128_v9, 4  ;;  %1130 = vrot.lane.b32.xlu1 %v1128_v9, %s1522_s0 }
 0x8ef   :  { %1134 = vrot.lane.b32.xlu2 %v1133_v15, %s1521_s7 }
 0x8f0   :  { %1189 = vrot.lane.b32.xlu0 %v1188_v5, %s1522_s0 }
 0x949   :  { %v1135_v31 = vpop.permute.xlu2 %1134 }
 0x960   :  { %v1131_v51 = vpop.permute.xlu1 %1130 }
 0x961   :  { %v1137_v59 = vsel %vm141_vm0, %v1131_v51, %v1135_v31 }
 0x962   :  { %v1139_v60 = vrot.slane %v1137_v59, 4  ;;  %v1190_v7 = vpop.permute.xlu0 %1189 }
 0x963   :  { %1446 = vmatmul.msk.f32.vlgmr.msra.gmra.mxu3 %vm141_vm0, %v1190_v7 }
 0x964   :  { %1445 = vmatmul.msk.f32.vlgmr.msra.gmra.mxu2 %vm916_vm4, %v1139_v60 }
 0x9e6   :  { %v1210_v61 = vpop.f32.mrf.mxu3 }
 0x9e7   :  { %v1214_v63 = vrot.slane %v1210_v61, 2  ;;  %v1159_v0 = vpop.f32.mrf.mxu2 }
 0x9e8   :  { %v1160_v1 = vadd.f32 %v2576_v10, %v1159_v0 }
 0x9e9   :  { %v1216_v2 = vadd.f32 %v1214_v63, %v2481_v27 }
 0x9ea   :  { %v1162_v3 = vmul.f32 %v1160_v1, %v2483_v34  ;;  %v1343_v1 = vld [vmem:[%s2728_s12 + $0x18] sm:$0xff] }
 0x9eb   :  { %v1217_v6 = vmul.f32 %v1216_v2, %v2483_v34  ;;  %1363 = vmatpush.msrb.mxu2 %v1343_v1  ;;  %v1342_v2 = vld [vmem:[%s2728_s12 + $0x10] sm:$0xff] }
 0x9ec   :  { %1503 = vtanh.f32 %v1162_v3  ;;  %v1341_v3 = vld [vmem:[%s2728_s12 + $0x8] sm:$0xff] }
 0x9ed   :  { %1505 = vtanh.f32 %v1217_v6  ;;  %1364 = vmatpush.msrb.mxu2 %v1342_v2  ;;  %v1340_v6 = vld [vmem:[%s2728_s12] sm:$0xff] }
 0x9ef   :  { %1365 = vmatpush.msrb.mxu2 %v1341_v3 }
 0x9f1   :  { %1366 = vmatpush.msrb.mxu2 %v1340_v6 }
 0x9f2   :  { %v1504_v8 = vpop.eup %1503 }
 0x9f3   :  { %v1506_v35 = vpop.eup %1505  ;;  %v1164_v11 = vmul.f32 %v1504_v8, %v2483_v34  ;;  %v1375_v8 = vld [vmem:[%s2729_s14 + $0x18] sm:$0xff] }
 0x9f4   :  { %v1219_v12 = vmul.f32 %v1506_v35, %v2483_v34  ;;  %v1374_v35 = vld [vmem:[%s2729_s14 + $0x10] sm:$0xff]  ;;  %1395 = vmatpush.msra.mxu2 %v1375_v8 }
 0x9f5   :  { %v1165_v54 = vadd.f32 %v1164_v11, %v2487_v48 }
 0x9f6   :  { %v1220_v53 = vadd.f32 %v1219_v12, %v2487_v48  ;;  %1396 = vmatpush.msra.mxu2 %v1374_v35 }
 0x9f7   :  { %1168 = vrot.lane.b32.xlu1 %v1165_v54, %s1521_s7  ;;  %v1166_v32 = vmul.f32 %v1165_v54, %v1064_v21 }
 0x9f8   :  { %1226 = vrot.lane.b32.xlu2 %v1220_v53, %s1521_s7  ;;  %v1224_v55 = vmul.f32 %v1222_v23, %v1220_v53 }
 0xa52   :  { %v1227_v27 = vpop.permute.xlu2 %1226 }
 0xa53   :  { %v1229_v18 = vmul.f32 %v1227_v27, %v1220_v53 }
 0xa55   :  { %1231 = vrot.lane.b32.xlu1 %v1229_v18, %s1522_s0 }
 0xa69   :  { %v1169_v49 = vpop.permute.xlu1 %1168 }
 0xa6a   :  { %v1171_v20 = vmul.f32 %v1169_v49, %v1165_v54 }
 0xa6c   :  { %1173 = vrot.lane.b32.xlu0 %v1171_v20, %s1522_s0 }
 0xac7   :  { %v1232_v25 = vpop.permute.xlu1 %1231 }
 0xac8   :  { %v1234_v22 = vadd.f32 %v1232_v25, %v1224_v55  ;;  %v1479_v55 = vld [vmem:[%s2725_s10] ss:$0 sm:$0xff] }
 0xaca   :  { %1507 = vtanh.f32 %v1234_v22 }
 0xad0   :  { %v1508_v16 = vpop.eup %1507 }
 0xad1   :  { %1237 = vrot.lane.b32.xlu0 %v1508_v16, %s1521_s7  ;;  %v1480_v16 = vld [vmem:[%s2726_s11] ss:$0 sm:$0xff] }
 0xade   :  { %v1174_v28 = vpop.permute.xlu0 %1173 }
 0xadf   :  { %v1176_v26 = vadd.f32 %v1174_v28, %v1166_v32 }
 0xae1   :  { %1509 = vtanh.f32 %v1176_v26 }
 0xae7   :  { %v1510_v24 = vpop.eup %1509 }
 0xae8   :  { %1179 = vrot.lane.b32.xlu2 %v1510_v24, %s1521_s7  ;;  %v1372_v24 = vld [vmem:[%s2729_s14] sm:$0xff] }
 0xb42   :  { %v1180_v38 = vpop.permute.xlu2 %1179 }
 0xb43   :  { %v1182_v39 = vmul.f32 %v1180_v38, %v1165_v54  ;;  %v1238_v40 = vpop.permute.xlu0 %1237  ;;  %v1481_v38 = vld [vmem:[%s2727_s13] ss:$0 sm:$0xff] }
 0xb44   :  { %v1240_v41 = vmul.f32 %v1238_v40, %v1220_v53 }
 0xb45   :  { %v1245_v37 = vrot.slane %v1182_v39, 2 }
 0xb46   :  { %1242 = vrot.lane.b32.xlu1 %v1240_v41, %s1522_s0 }
 0xb47   :  { %1246 = vrot.lane.b32.xlu2 %v1245_v37, %s1521_s7  ;;  %v1482_v37 = vld [vmem:[%s2730_s15] ss:$0 sm:$0xff] }
 0xba1   :  { %v1247_v47 = vpop.permute.xlu2 %1246 }
 0xbb8   :  { %v1243_v58 = vpop.permute.xlu1 %1242 }
 0xbb9   :  { %v1249_v19 = vsel %vm141_vm0, %v1243_v58, %v1247_v47 }
 0xbba   :  { %v1251_v36 = vrot.slane %v1249_v19, 6 }
 0xbbc   :  { %1447 = vmatmul.msk.f32.vlgmr.msrb.gmra.mxu3 %vm916_vm4, %v1251_v36 }
 0xc3f   :  { %v1271_v43 = vpop.f32.mrf.mxu3 }
 0xc40   :  { %v1272_v4 = vadd.f32 %v2576_v10, %v1271_v43 }
 0xc42   :  { %v1274_v14 = vmul.f32 %v1272_v4, %v2483_v34 }
 0xc44   :  { %1511 = vtanh.f32 %v1274_v14 }
 0xc4a   :  { %v1512_v44 = vpop.eup %1511 }
 0xc4b   :  { %v1276_v45 = vmul.f32 %v1512_v44, %v2483_v34 }
 0xc4d   :  { %v1277_v46 = vadd.f32 %v1276_v45, %v2487_v48 }
 0xc4f   :  { %1280 = vrot.lane.b32.xlu0 %v1277_v46, %s1521_s7  ;;  %v1278_v10 = vmul.f32 %v1277_v46, %v1176_v26  ;;  %v1373_v26 = vld [vmem:[%s2729_s14 + $0x8] sm:$0xff] }
 0xc50   :  { %1397 = vmatpush.msra.mxu2 %v1373_v26 }
 0xc52   :  { %1398 = vmatpush.msra.mxu2 %v1372_v24 }
 0xc57   :  { %962 = vrot.lane.b32.xlu0 %v2596_v17, %s1522_s0 }
 0xcc1   :  { %v1281_v50 = vpop.permute.xlu0 %1280 }
 0xcc2   :  { %v1283_v42 = vmul.f32 %v1281_v50, %v1277_v46 }
 0xcc4   :  { %1285 = vrot.lane.b32.xlu1 %v1283_v42, %s1522_s0 }
 0xcc9   :  { %v963_v13 = vpop.permute.xlu0 %962 }
 0xcca   :  { %966 = vst.msk [vmem:[#allocation2] sm:$0x3] %vm965_vm5, %v963_v13 }
 0xccc   :  { %1072 = vrot.lane.b32.xlu1 %v2628_v29, %s1522_s0 }
 0xd36   :  { %v1286_v34 = vpop.permute.xlu1 %1285 }
 0xd37   :  { %v1288_v33 = vadd.f32 %v1286_v34, %v1278_v10 }
 0xd39   :  { %1513 = vtanh.f32 %v1288_v33 }
 0xd3a   :  { %1515 = vrcp.f32 %v1523_v52 }
 0xd3e   :  { %v1073_v48 = vpop.permute.xlu1 %1072 }
 0xd3f   :  { %v1514_v56 = vpop.eup %1513  ;;  %1075 = vst.msk [vmem:[#allocation2 + $0x2] sm:$0x3] %vm965_vm5, %v1073_v48 }
 0xd40   :  { %1291 = vrot.lane.b32.xlu2 %v1514_v56, %s1521_s7  ;;  %v1516_v9 = vpop.eup %1515 }
 0xd41   :  { %v1305_v15 = vmul.f32 32.0, %v1516_v9  ;;  %vm1309_vm6 = vweird.f32 %v1516_v9 }
 0xd43   :  { %v1306_v5 = vsub.f32 1.0, %v1305_v15 }
 0xd45   :  { %v1307_v31 = vmul.f32 %v1516_v9, %v1306_v5 }
 0xd47   :  { %v1308_v51 = vadd.f32 %v1516_v9, %v1307_v31 }
 0xd48   :  { %1184 = vrot.lane.b32.xlu2 %v1182_v39, %s1522_s0 }
 0xd49   :  { %v1310_v59 = vsel %vm1309_vm6, %v1516_v9, %v1308_v51 }
 0xd9a   :  { %v1292_v17 = vpop.permute.xlu2 %1291 }
 0xd9b   :  { %v1294_v62 = vmul.f32 %v1292_v17, %v1277_v46 }
 0xd9d   :  { %1296 = vrot.lane.b32.xlu0 %v1294_v62, %s1522_s0 }
 0xda2   :  { %v1185_v21 = vpop.permute.xlu2 %1184 }
 0xda3   :  { %1187 = vst.msk [vmem:[#allocation2 + $0x4] sm:$0x3] %vm965_vm5, %v1185_v21 }
 0xe0f   :  { %v1297_v30 = vpop.permute.xlu0 %1296 }
 0xe10   :  { %1299 = vst.msk [vmem:[#allocation2 + $0x6] sm:$0x3] %vm965_vm5, %v1297_v30 }
 0xe17   :  { %v1300_v57 = vld [vmem:[#allocation2] sm:$0xff] }
 0xe18   :  { %v1301_v29 = vsel %vm141_vm0, %v1300_v57, 0.0 }
 0xe19   :  { %1302 = vadd.xlane.f32.xlu1 %v1301_v29 }
 0xe8c   :  { %v1303_v60 = vpop.xlane.xlu1 %1302 }
 0xe8d   :  { %v1311_v7 = vmul.f32 %v1310_v59, %v1303_v60 }
 0xe8f   :  { %v1312_v61 = vsub.f32 %v1300_v57, %v1311_v7 }
 0xe91   :  { %v1313_v63 = vmul.f32 %v1312_v61, %v1312_v61 }
 0xe93   :  { %v1314_v0 = vsel %vm141_vm0, %v1313_v63, 0.0 }
 0xe94   :  { %1315 = vadd.xlane.f32.xlu2 %v1314_v0 }
 0xf07   :  { %v1316_v11 = vpop.xlane.xlu2 %1315 }
 0xf08   :  { %v1317_v12 = vmul.f32 %v1316_v11, %v1310_v59 }
 0xf0a   :  { %v1318_v54 = vadd.f32 1e-05, %v1317_v12 }
 0xf0c   :  { %1517 = vrsqrt.f32 %v1318_v54  ;;  %vm1325_vm8 = vweird.f32 %v1318_v54 }
 0xf12   :  { %v1518_v53 = vpop.eup %1517 }
 0xf13   :  { %v1320_v27 = vmul.f32 %v1518_v53, %v1318_v54  ;;  %vm1326_vm7 = vweird.f32 %v1518_v53 }
 0xf14   :  { %vm1327_vm9 = vmor %vm1325_vm8, %vm1326_vm7 }
 0xf15   :  { %v1321_v18 = vmul.f32 %v1518_v53, %v1320_v27 }
 0xf17   :  { %v1322_v49 = vmul.f32 0.5, %v1321_v18 }
 0xf19   :  { %v1323_v20 = vsub.f32 1.5, %v1322_v49 }
 0xf1b   :  { %v1324_v23 = vmul.f32 %v1518_v53, %v1323_v20 }
 0xf1d   :  { %v1328_v25 = vsel %vm1327_vm9, %v1518_v53, %v1324_v23 }
 0xf1e   :  { %v1329_v22 = vmul.f32 %v1328_v25, %v1312_v61 }
 0xf20   :  { %v1334_v32 = vmul.f32 %v1479_v55, %v1329_v22 }
 0xf22   :  { %v1339_v28 = vadd.f32 %v1480_v16, %v1334_v32 }
 0xf24   :  { %1448 = vmatmul.msk.f32.vlgmr.msrb.gmra.mxu2 %vm141_vm0, %v1339_v28 }
 0xfa7   :  { %v1368_v39 = vpop.f32.mrf.mxu2 }
 0xfa8   :  { %v1369_v40 = vadd.f32 %v1481_v38, %v1368_v39 }
 0xfaa   :  { %v1371_v41 = vmax.f32 %v1369_v40, 0.0 }
 0xfac   :  { %1449 = vmatmul.msk.f32.vlgmr.msra.gmra.mxu2 %vm141_vm0, %v1371_v41 }
0x102f   :  { %v1400_v47 = vpop.f32.mrf.mxu2 }
0x1030   :  { %v1401_v58 = vadd.f32 %v1482_v37, %v1400_v47 }
0x1032   :  { %1403 = vst [vmem:[%s2731_s16] sm:$0xff] %v1401_v58 }

</bundles_post_ra>
